<compile_context>
chip_gen: v6e
topology: v6e:2x2x1
jax: 0.10.0
libtpu: 0.0.40
codegen_flags: <defaults>
</compile_context>

<pallas_src>
import jax
import jax.numpy as jnp
from jax.experimental import pallas as pl
from jax.experimental.pallas import tpu as pltpu

# ----------------------------- model config ---------------------------------
B, S, H = 2, 8, 32          # batch, seq len, hidden
TOK = B * S                 # flattened token count
NUM_HEADS = 2
DH = H // NUM_HEADS
FFN = 64
NUM_LAYERS = 2
VOCAB = 50
TYPE_VOCAB = 2
LN_EPS = 1e-12              # BERT layer-norm eps
POOL_EPS = 1e-9             # sentence-transformers mean-pool clamp
NORM_EPS = 1e-12            # F.normalize clamp_min eps


# ----------------------------- kernel helpers --------------------------------
def _layer_norm(x, gamma, beta):
    mean = jnp.mean(x, axis=-1, keepdims=True)
    var = jnp.mean((x - mean) ** 2, axis=-1, keepdims=True)
    return (x - mean) * jax.lax.rsqrt(var + LN_EPS) * gamma + beta


def _gelu(x):
    # TODO(synk): HF BERT uses erf-based GELU; tanh approximation used here.
    c = jnp.float32(0.7978845608028654)  # sqrt(2/pi)
    return 0.5 * x * (1.0 + jnp.tanh(c * (x + 0.044715 * x * x * x)))


# ---------------- fused encoder stack + pooling + normalize kernel -----------
def fused_encoder_kernel(h0_ref, mask_ref,
                         wqkv_ref, bqkv_ref, wo_ref, bo_ref,
                         ln1_g_ref, ln1_b_ref,
                         w1_ref, b1_ref, w2_ref, b2_ref,
                         ln2_g_ref, ln2_b_ref,
                         sent_ref, tok_ref,
                         ctx_scratch):
    mask = mask_ref[...]                                   # (B, S)
    # additive attention bias from padding mask, computed ONCE for all layers
    bias = ((1.0 - mask) * (-1e9))[:, None, :]             # (B, 1, S_key)
    scale = jnp.float32(1.0 / (DH ** 0.5))

    # flattened (B*S, H) activation for all dense matmuls
    x2 = h0_ref[...].reshape(TOK, H)

    for l in range(NUM_LAYERS):                            # static unrolled loop
        # fused QKV projection: one (TOK,H) x (H,3H) matmul
        qkv = (jnp.dot(x2, wqkv_ref[l], preferred_element_type=jnp.float32)
               + bqkv_ref[l])                              # (TOK, 3H)
        q = qkv[:, 0:H].reshape(B, S, H)
        k = qkv[:, H:2 * H].reshape(B, S, H)
        v = qkv[:, 2 * H:3 * H].reshape(B, S, H)

        # per-head attention; head contexts gathered into VMEM scratch so the
        # output projection below is one full-width matmul.
        # TODO(synk): at real hidden sizes, batch heads into one 4-D einsum
        # instead of a static per-head loop over lane slices.
        for hd in range(NUM_HEADS):
            lo = hd * DH
            qh = q[:, :, lo:lo + DH]                       # (B, S, DH)
            kh = k[:, :, lo:lo + DH]
            vh = v[:, :, lo:lo + DH]
            scores = jnp.einsum('bsd,btd->bst', qh, kh,
                                preferred_element_type=jnp.float32) * scale + bias
            scores = scores - jnp.max(scores, axis=-1, keepdims=True)
            e = jnp.exp(scores)
            inv_den = pl.reciprocal(jnp.sum(e, axis=-1, keepdims=True),
                                    approx=True)
            probs = e * inv_den
            ctx_h = jnp.einsum('bst,btd->bsd', probs, vh,
                               preferred_element_type=jnp.float32)
            ctx_scratch[:, lo:lo + DH] = ctx_h.reshape(TOK, DH)

        # single full-width attention output projection
        attn = (jnp.dot(ctx_scratch[...], wo_ref[l],
                        preferred_element_type=jnp.float32) + bo_ref[l])

        # residual + post-LN
        y = _layer_norm(x2 + attn, ln1_g_ref[l], ln1_b_ref[l])

        # feed-forward
        h1 = _gelu(jnp.dot(y, w1_ref[l],
                           preferred_element_type=jnp.float32) + b1_ref[l])
        h2 = jnp.dot(h1, w2_ref[l],
                     preferred_element_type=jnp.float32) + b2_ref[l]
        x2 = _layer_norm(y + h2, ln2_g_ref[l], ln2_b_ref[l])

    # ---- outputs: token embeddings (written once) + pooled sentence emb ----
    h_final = x2.reshape(B, S, H)
    tok_ref[...] = h_final

    summed = jnp.sum(h_final * mask[:, :, None], axis=1)           # (B, H)
    count = jnp.maximum(jnp.sum(mask, axis=1, keepdims=True), POOL_EPS)
    pooled = summed * pl.reciprocal(count, approx=True)            # mean pool
    norm = jnp.maximum(
        jnp.sqrt(jnp.sum(pooled * pooled, axis=1, keepdims=True)), NORM_EPS)
    sent_ref[...] = pooled / norm            # exact divide: unit-norm output


def _full_spec(shape):
    ndim = len(shape)
    return pl.BlockSpec(shape, lambda i, _n=ndim: (0,) * _n)


def dual_encoder_fused(h0, mask_f, p):
    inputs = [h0, mask_f,
              p['wqkv'], p['bqkv'], p['wo'], p['bo'],
              p['ln1_g'], p['ln1_b'],
              p['w1'], p['b1'], p['w2'], p['b2'],
              p['ln2_g'], p['ln2_b']]
    sent, tok = pl.pallas_call(
        fused_encoder_kernel,
        out_shape=(jax.ShapeDtypeStruct((B, H), jnp.float32),
                   jax.ShapeDtypeStruct((B, S, H), jnp.float32)),
        grid=(1,),
        in_specs=[_full_spec(a.shape) for a in inputs],
        out_specs=(_full_spec((B, H)), _full_spec((B, S, H))),
        scratch_shapes=[pltpu.VMEM((TOK, H), jnp.float32)],
        compiler_params=pltpu.CompilerParams(
            dimension_semantics=("arbitrary",)),
    )(*inputs)
    return sent, tok


# ------------------------------ parameters -----------------------------------
def init_params(key):
    def normal(k, shape):
        return (0.02 * jax.random.normal(k, shape)).astype(jnp.float32)

    keys = jax.random.split(key, 7)
    return {
        'word_emb': normal(keys[0], (VOCAB, H)),
        'pos_emb':  normal(keys[1], (S, H)),
        'type_emb': normal(keys[2], (TYPE_VOCAB, H)),
        'emb_ln_g': jnp.ones((H,), jnp.float32),
        'emb_ln_b': jnp.zeros((H,), jnp.float32),
        # per-layer weights stacked along a leading layer axis
        'wqkv': normal(keys[3], (NUM_LAYERS, H, 3 * H)),
        'bqkv': jnp.zeros((NUM_LAYERS, 1, 3 * H), jnp.float32),
        'wo':   normal(keys[4], (NUM_LAYERS, H, H)),
        'bo':   jnp.zeros((NUM_LAYERS, 1, H), jnp.float32),
        'ln1_g': jnp.ones((NUM_LAYERS, 1, H), jnp.float32),
        'ln1_b': jnp.zeros((NUM_LAYERS, 1, H), jnp.float32),
        'w1':   normal(keys[5], (NUM_LAYERS, H, FFN)),
        'b1':   jnp.zeros((NUM_LAYERS, 1, FFN), jnp.float32),
        'w2':   normal(keys[6], (NUM_LAYERS, FFN, H)),
        'b2':   jnp.zeros((NUM_LAYERS, 1, H), jnp.float32),
        'ln2_g': jnp.ones((NUM_LAYERS, 1, H), jnp.float32),
        'ln2_b': jnp.zeros((NUM_LAYERS, 1, H), jnp.float32),
    }


# ------------------------------- forward --------------------------------------
@jax.jit
def dual_encoder_forward(params, input_ids, token_type_ids, attention_mask):
    # glue: embedding gathers + embedding LayerNorm in plain JAX
    positions = jnp.arange(S, dtype=jnp.int32)[None, :]
    emb = (params['word_emb'][input_ids]
           + params['pos_emb'][positions]
           + params['type_emb'][token_type_ids])
    mean = jnp.mean(emb, axis=-1, keepdims=True)
    var = jnp.mean((emb - mean) ** 2, axis=-1, keepdims=True)
    h0 = (emb - mean) * jax.lax.rsqrt(var + LN_EPS) * params['emb_ln_g'] \
        + params['emb_ln_b']

    mask_f = attention_mask.astype(jnp.float32)
    sent, tok = dual_encoder_fused(h0, mask_f, params)   # single fused Pallas call
    return {'sentence_embedding': sent, 'token_embeddings': tok}


# --------------------------------- main ---------------------------------------
if __name__ == "__main__":
    key = jax.random.PRNGKey(0)
    pkey, ikey = jax.random.split(key)
    params = init_params(pkey)

    input_ids = jax.random.randint(ikey, (B, S), 0, VOCAB, dtype=jnp.int32)
    token_type_ids = jnp.zeros((B, S), dtype=jnp.int32)
    attention_mask = jnp.array([[1, 1, 1, 1, 1, 1, 1, 1],
                                [1, 1, 1, 1, 1, 0, 0, 0]], dtype=jnp.int32)

    out = dual_encoder_forward(params, input_ids, token_type_ids, attention_mask)
    out = jax.block_until_ready(out)

    sent = out['sentence_embedding']
    tok = out['token_embeddings']
    assert sent.shape == (B, H) and tok.shape == (B, S, H)
    assert bool(jnp.all(jnp.isfinite(sent))) and bool(jnp.all(jnp.isfinite(tok)))
    # sanity: L2-normalized sentence embeddings have unit norm
    norms = jnp.sqrt(jnp.sum(sent * sent, axis=1))
    assert bool(jnp.all(jnp.abs(norms - 1.0) < 1e-4))

    print("KERNEL_OK")
</pallas_src>

<mosaic_0001>
module attributes {stable_mosaic.version = 11 : i64} {
  func.func @fused_encoder_kernel(%arg0: i32, %arg1: memref<2x8x32xf32, #tpu.memory_space<vmem>>, %arg2: memref<2x8xf32, #tpu.memory_space<vmem>>, %arg3: memref<2x32x96xf32, #tpu.memory_space<vmem>>, %arg4: memref<2x1x96xf32, #tpu.memory_space<vmem>>, %arg5: memref<2x32x32xf32, #tpu.memory_space<vmem>>, %arg6: memref<2x1x32xf32, #tpu.memory_space<vmem>>, %arg7: memref<2x1x32xf32, #tpu.memory_space<vmem>>, %arg8: memref<2x1x32xf32, #tpu.memory_space<vmem>>, %arg9: memref<2x32x64xf32, #tpu.memory_space<vmem>>, %arg10: memref<2x1x64xf32, #tpu.memory_space<vmem>>, %arg11: memref<2x64x32xf32, #tpu.memory_space<vmem>>, %arg12: memref<2x1x32xf32, #tpu.memory_space<vmem>>, %arg13: memref<2x1x32xf32, #tpu.memory_space<vmem>>, %arg14: memref<2x1x32xf32, #tpu.memory_space<vmem>>, %arg15: memref<2x32xf32, #tpu.memory_space<vmem>>, %arg16: memref<2x8x32xf32, #tpu.memory_space<vmem>>, %arg17: memref<16x32xf32, #tpu.memory_space<vmem>>) attributes {dimension_semantics = [#tpu.dimension_semantics<arbitrary>], iteration_bounds = array<i64: 1>, scalar_prefetch = 0 : i64, scratch_operands = 1 : i64, tpu.core_type = #tpu.core_type<tc>, window_params = [{pipeline_mode = #tpu.pipeline_mode<synchronous>, transform_indices = @transform_0, window_bounds = array<i64: 2, 8, 32>}, {pipeline_mode = #tpu.pipeline_mode<synchronous>, transform_indices = @transform_1, window_bounds = array<i64: 2, 8>}, {pipeline_mode = #tpu.pipeline_mode<synchronous>, transform_indices = @transform_2, window_bounds = array<i64: 2, 32, 96>}, {pipeline_mode = #tpu.pipeline_mode<synchronous>, transform_indices = @transform_3, window_bounds = array<i64: 2, 1, 96>}, {pipeline_mode = #tpu.pipeline_mode<synchronous>, transform_indices = @transform_4, window_bounds = array<i64: 2, 32, 32>}, {pipeline_mode = #tpu.pipeline_mode<synchronous>, transform_indices = @transform_5, window_bounds = array<i64: 2, 1, 32>}, {pipeline_mode = #tpu.pipeline_mode<synchronous>, transform_indices = @transform_6, window_bounds = array<i64: 2, 1, 32>}, {pipeline_mode = #tpu.pipeline_mode<synchronous>, transform_indices = @transform_7, window_bounds = array<i64: 2, 1, 32>}, {pipeline_mode = #tpu.pipeline_mode<synchronous>, transform_indices = @transform_8, window_bounds = array<i64: 2, 32, 64>}, {pipeline_mode = #tpu.pipeline_mode<synchronous>, transform_indices = @transform_9, window_bounds = array<i64: 2, 1, 64>}, {pipeline_mode = #tpu.pipeline_mode<synchronous>, transform_indices = @transform_10, window_bounds = array<i64: 2, 64, 32>}, {pipeline_mode = #tpu.pipeline_mode<synchronous>, transform_indices = @transform_11, window_bounds = array<i64: 2, 1, 32>}, {pipeline_mode = #tpu.pipeline_mode<synchronous>, transform_indices = @transform_12, window_bounds = array<i64: 2, 1, 32>}, {pipeline_mode = #tpu.pipeline_mode<synchronous>, transform_indices = @transform_13, window_bounds = array<i64: 2, 1, 32>}, {pipeline_mode = #tpu.pipeline_mode<synchronous>, transform_indices = @transform_14, window_bounds = array<i64: 2, 32>}, {pipeline_mode = #tpu.pipeline_mode<synchronous>, transform_indices = @transform_15, window_bounds = array<i64: 2, 8, 32>}]} {
    %c0 = arith.constant 0 : index
    %c0_0 = arith.constant 0 : index
    %0 = vector.load %arg2[%c0, %c0_0] : memref<2x8xf32, #tpu.memory_space<vmem>>, vector<2x8xf32>
    %cst = arith.constant 1.000000e+00 : f32
    %1 = vector.broadcast %cst : f32 to vector<2x8xf32>
    %2 = arith.subf %1, %0 : vector<2x8xf32>
    %cst_1 = arith.constant -1.000000e+09 : f32
    %3 = vector.broadcast %cst_1 : f32 to vector<2x8xf32>
    %4 = arith.mulf %2, %3 : vector<2x8xf32>
    %5 = vector.shape_cast %4 : vector<2x8xf32> to vector<2x1x8xf32>
    %c0_2 = arith.constant 0 : index
    %c0_3 = arith.constant 0 : index
    %c0_4 = arith.constant 0 : index
    %6 = vector.load %arg1[%c0_2, %c0_3, %c0_4] : memref<2x8x32xf32, #tpu.memory_space<vmem>>, vector<2x8x32xf32>
    %7 = vector.shape_cast %6 : vector<2x8x32xf32> to vector<16x32xf32>
    %c0_5 = arith.constant 0 : index
    %c0_6 = arith.constant 0 : index
    %c0_7 = arith.constant 0 : index
    %8 = vector.load %arg3[%c0_5, %c0_6, %c0_7] : memref<2x32x96xf32, #tpu.memory_space<vmem>>, vector<1x32x96xf32>
    %9 = vector.shape_cast %8 : vector<1x32x96xf32> to vector<32x96xf32>
    %cst_8 = arith.constant dense<0.000000e+00> : vector<16x96xf32>
    %10 = tpu.matmul %7, %9, %cst_8 {dimension_numbers = #tpu.dot_dimension_numbers<[1], [0], [0], [1], [0, 0, 1, 1], [], []>} : vector<16x32xf32>, vector<32x96xf32>, vector<16x96xf32> -> vector<16x96xf32>
    %c0_9 = arith.constant 0 : index
    %c0_10 = arith.constant 0 : index
    %c0_11 = arith.constant 0 : index
    %11 = vector.load %arg4[%c0_9, %c0_10, %c0_11] : memref<2x1x96xf32, #tpu.memory_space<vmem>>, vector<1x1x96xf32>
    %12 = vector.shape_cast %11 : vector<1x1x96xf32> to vector<1x96xf32>
    %13 = vector.broadcast %12 : vector<1x96xf32> to vector<16x96xf32>
    %14 = arith.addf %10, %13 : vector<16x96xf32>
    %15 = vector.extract_strided_slice %14 {offsets = [0, 0], sizes = [16, 32], strides = [1, 1]} : vector<16x96xf32> to vector<16x32xf32>
    %16 = vector.shape_cast %15 : vector<16x32xf32> to vector<2x8x32xf32>
    %17 = vector.extract_strided_slice %14 {offsets = [0, 32], sizes = [16, 32], strides = [1, 1]} : vector<16x96xf32> to vector<16x32xf32>
    %18 = vector.shape_cast %17 : vector<16x32xf32> to vector<2x8x32xf32>
    %19 = vector.extract_strided_slice %14 {offsets = [0, 64], sizes = [16, 32], strides = [1, 1]} : vector<16x96xf32> to vector<16x32xf32>
    %20 = vector.shape_cast %19 : vector<16x32xf32> to vector<2x8x32xf32>
    %21 = vector.extract_strided_slice %16 {offsets = [0, 0, 0], sizes = [2, 8, 16], strides = [1, 1, 1]} : vector<2x8x32xf32> to vector<2x8x16xf32>
    %22 = vector.extract_strided_slice %18 {offsets = [0, 0, 0], sizes = [2, 8, 16], strides = [1, 1, 1]} : vector<2x8x32xf32> to vector<2x8x16xf32>
    %23 = vector.extract_strided_slice %20 {offsets = [0, 0, 0], sizes = [2, 8, 16], strides = [1, 1, 1]} : vector<2x8x32xf32> to vector<2x8x16xf32>
    "tpu.trace_start"() <{level = 10 : i32, message = "bsd,btd->bst"}> : () -> ()
    %cst_12 = arith.constant dense<0.000000e+00> : vector<2x8x8xf32>
    %24 = tpu.matmul %21, %22, %cst_12 {dimension_numbers = #tpu.dot_dimension_numbers<[2], [2], [1], [1], [0, 0, 0, 1, 1, 1], [0], [0]>} : vector<2x8x16xf32>, vector<2x8x16xf32>, vector<2x8x8xf32> -> vector<2x8x8xf32>
    "tpu.trace_stop"() : () -> ()
    %cst_13 = arith.constant 2.500000e-01 : f32
    %25 = vector.broadcast %cst_13 : f32 to vector<2x8x8xf32>
    %26 = arith.mulf %24, %25 : vector<2x8x8xf32>
    %27 = vector.broadcast %5 : vector<2x1x8xf32> to vector<2x8x8xf32>
    %28 = arith.addf %26, %27 : vector<2x8x8xf32>
    %cst_14 = arith.constant dense<0xFF800000> : vector<2x8xf32>
    %29 = vector.multi_reduction <maximumf>, %28, %cst_14 [2] : vector<2x8x8xf32> to vector<2x8xf32>
    %30 = vector.shape_cast %29 : vector<2x8xf32> to vector<2x8x1xf32>
    %31 = vector.broadcast %30 : vector<2x8x1xf32> to vector<2x8x8xf32>
    %32 = arith.subf %28, %31 : vector<2x8x8xf32>
    %33 = math.exp %32 : vector<2x8x8xf32>
    %cst_15 = arith.constant dense<0.000000e+00> : vector<2x8xf32>
    %34 = vector.multi_reduction <add>, %33, %cst_15 [2] : vector<2x8x8xf32> to vector<2x8xf32>
    %35 = vector.shape_cast %34 : vector<2x8xf32> to vector<2x8x1xf32>
    %36 = tpu.reciprocal %35 {approx = true} : vector<2x8x1xf32> -> vector<2x8x1xf32>
    %37 = vector.broadcast %36 : vector<2x8x1xf32> to vector<2x8x8xf32>
    %38 = arith.mulf %33, %37 : vector<2x8x8xf32>
    "tpu.trace_start"() <{level = 10 : i32, message = "bst,btd->bsd"}> : () -> ()
    %cst_16 = arith.constant dense<0.000000e+00> : vector<2x8x16xf32>
    %39 = tpu.matmul %38, %23, %cst_16 {dimension_numbers = #tpu.dot_dimension_numbers<[2], [1], [1], [2], [0, 0, 0, 1, 1, 2], [0], [0]>} : vector<2x8x8xf32>, vector<2x8x16xf32>, vector<2x8x16xf32> -> vector<2x8x16xf32>
    "tpu.trace_stop"() : () -> ()
    %40 = vector.shape_cast %39 : vector<2x8x16xf32> to vector<16x16xf32>
    %c0_17 = arith.constant 0 : index
    %c0_18 = arith.constant 0 : index
    %41 = vector.load %arg17[%c0_17, %c0_18] : memref<16x32xf32, #tpu.memory_space<vmem>>, vector<16x16xf32>
    tpu.vector_store %arg17[%c0_17, %c0_18], %40 {strides = array<i32>} : memref<16x32xf32, #tpu.memory_space<vmem>>, vector<16x16xf32>,
    %42 = vector.extract_strided_slice %16 {offsets = [0, 0, 16], sizes = [2, 8, 16], strides = [1, 1, 1]} : vector<2x8x32xf32> to vector<2x8x16xf32>
    %43 = vector.extract_strided_slice %18 {offsets = [0, 0, 16], sizes = [2, 8, 16], strides = [1, 1, 1]} : vector<2x8x32xf32> to vector<2x8x16xf32>
    %44 = vector.extract_strided_slice %20 {offsets = [0, 0, 16], sizes = [2, 8, 16], strides = [1, 1, 1]} : vector<2x8x32xf32> to vector<2x8x16xf32>
    "tpu.trace_start"() <{level = 10 : i32, message = "bsd,btd->bst"}> : () -> ()
    %cst_19 = arith.constant dense<0.000000e+00> : vector<2x8x8xf32>
    %45 = tpu.matmul %42, %43, %cst_19 {dimension_numbers = #tpu.dot_dimension_numbers<[2], [2], [1], [1], [0, 0, 0, 1, 1, 1], [0], [0]>} : vector<2x8x16xf32>, vector<2x8x16xf32>, vector<2x8x8xf32> -> vector<2x8x8xf32>
    "tpu.trace_stop"() : () -> ()
    %cst_20 = arith.constant 2.500000e-01 : f32
    %46 = vector.broadcast %cst_20 : f32 to vector<2x8x8xf32>
    %47 = arith.mulf %45, %46 : vector<2x8x8xf32>
    %48 = vector.broadcast %5 : vector<2x1x8xf32> to vector<2x8x8xf32>
    %49 = arith.addf %47, %48 : vector<2x8x8xf32>
    %cst_21 = arith.constant dense<0xFF800000> : vector<2x8xf32>
    %50 = vector.multi_reduction <maximumf>, %49, %cst_21 [2] : vector<2x8x8xf32> to vector<2x8xf32>
    %51 = vector.shape_cast %50 : vector<2x8xf32> to vector<2x8x1xf32>
    %52 = vector.broadcast %51 : vector<2x8x1xf32> to vector<2x8x8xf32>
    %53 = arith.subf %49, %52 : vector<2x8x8xf32>
    %54 = math.exp %53 : vector<2x8x8xf32>
    %cst_22 = arith.constant dense<0.000000e+00> : vector<2x8xf32>
    %55 = vector.multi_reduction <add>, %54, %cst_22 [2] : vector<2x8x8xf32> to vector<2x8xf32>
    %56 = vector.shape_cast %55 : vector<2x8xf32> to vector<2x8x1xf32>
    %57 = tpu.reciprocal %56 {approx = true} : vector<2x8x1xf32> -> vector<2x8x1xf32>
    %58 = vector.broadcast %57 : vector<2x8x1xf32> to vector<2x8x8xf32>
    %59 = arith.mulf %54, %58 : vector<2x8x8xf32>
    "tpu.trace_start"() <{level = 10 : i32, message = "bst,btd->bsd"}> : () -> ()
    %cst_23 = arith.constant dense<0.000000e+00> : vector<2x8x16xf32>
    %60 = tpu.matmul %59, %44, %cst_23 {dimension_numbers = #tpu.dot_dimension_numbers<[2], [1], [1], [2], [0, 0, 0, 1, 1, 2], [0], [0]>} : vector<2x8x8xf32>, vector<2x8x16xf32>, vector<2x8x16xf32> -> vector<2x8x16xf32>
    "tpu.trace_stop"() : () -> ()
    %61 = vector.shape_cast %60 : vector<2x8x16xf32> to vector<16x16xf32>
    %c0_24 = arith.constant 0 : index
    %c16 = arith.constant 16 : index
    %62 = vector.load %arg17[%c0_24, %c16] : memref<16x32xf32, #tpu.memory_space<vmem>>, vector<16x16xf32>
    tpu.vector_store %arg17[%c0_24, %c16], %61 {strides = array<i32>} : memref<16x32xf32, #tpu.memory_space<vmem>>, vector<16x16xf32>,
    %c0_25 = arith.constant 0 : index
    %c0_26 = arith.constant 0 : index
    %63 = vector.load %arg17[%c0_25, %c0_26] : memref<16x32xf32, #tpu.memory_space<vmem>>, vector<16x32xf32>
    %c0_27 = arith.constant 0 : index
    %c0_28 = arith.constant 0 : index
    %c0_29 = arith.constant 0 : index
    %64 = vector.load %arg5[%c0_27, %c0_28, %c0_29] : memref<2x32x32xf32, #tpu.memory_space<vmem>>, vector<1x32x32xf32>
    %65 = vector.shape_cast %64 : vector<1x32x32xf32> to vector<32x32xf32>
    %cst_30 = arith.constant dense<0.000000e+00> : vector<16x32xf32>
    %66 = tpu.matmul %63, %65, %cst_30 {dimension_numbers = #tpu.dot_dimension_numbers<[1], [0], [0], [1], [0, 0, 1, 1], [], []>} : vector<16x32xf32>, vector<32x32xf32>, vector<16x32xf32> -> vector<16x32xf32>
    %c0_31 = arith.constant 0 : index
    %c0_32 = arith.constant 0 : index
    %c0_33 = arith.constant 0 : index
    %67 = vector.load %arg6[%c0_31, %c0_32, %c0_33] : memref<2x1x32xf32, #tpu.memory_space<vmem>>, vector<1x1x32xf32>
    %68 = vector.shape_cast %67 : vector<1x1x32xf32> to vector<1x32xf32>
    %69 = vector.broadcast %68 : vector<1x32xf32> to vector<16x32xf32>
    %70 = arith.addf %66, %69 : vector<16x32xf32>
    %71 = arith.addf %7, %70 : vector<16x32xf32>
    %c0_34 = arith.constant 0 : index
    %c0_35 = arith.constant 0 : index
    %c0_36 = arith.constant 0 : index
    %72 = vector.load %arg7[%c0_34, %c0_35, %c0_36] : memref<2x1x32xf32, #tpu.memory_space<vmem>>, vector<1x1x32xf32>
    %73 = vector.shape_cast %72 : vector<1x1x32xf32> to vector<1x32xf32>
    %c0_37 = arith.constant 0 : index
    %c0_38 = arith.constant 0 : index
    %c0_39 = arith.constant 0 : index
    %74 = vector.load %arg8[%c0_37, %c0_38, %c0_39] : memref<2x1x32xf32, #tpu.memory_space<vmem>>, vector<1x1x32xf32>
    %75 = vector.shape_cast %74 : vector<1x1x32xf32> to vector<1x32xf32>
    %cst_40 = arith.constant dense<0.000000e+00> : vector<16xf32>
    %76 = vector.multi_reduction <add>, %71, %cst_40 [1] : vector<16x32xf32> to vector<16xf32>
    %77 = vector.shape_cast %76 : vector<16xf32> to vector<16x1xf32>
    %cst_41 = arith.constant 3.200000e+01 : f32
    %78 = vector.broadcast %cst_41 : f32 to vector<16x1xf32>
    %79 = arith.divf %77, %78 : vector<16x1xf32>
    %80 = vector.broadcast %79 : vector<16x1xf32> to vector<16x32xf32>
    %81 = arith.subf %71, %80 : vector<16x32xf32>
    %82 = arith.mulf %81, %81 : vector<16x32xf32>
    %cst_42 = arith.constant dense<0.000000e+00> : vector<16xf32>
    %83 = vector.multi_reduction <add>, %82, %cst_42 [1] : vector<16x32xf32> to vector<16xf32>
    %84 = vector.shape_cast %83 : vector<16xf32> to vector<16x1xf32>
    %cst_43 = arith.constant 3.200000e+01 : f32
    %85 = vector.broadcast %cst_43 : f32 to vector<16x1xf32>
    %86 = arith.divf %84, %85 : vector<16x1xf32>
    %87 = vector.broadcast %79 : vector<16x1xf32> to vector<16x32xf32>
    %88 = arith.subf %71, %87 : vector<16x32xf32>
    %cst_44 = arith.constant 9.99999996E-13 : f32
    %89 = vector.broadcast %cst_44 : f32 to vector<16x1xf32>
    %90 = arith.addf %86, %89 : vector<16x1xf32>
    %91 = math.rsqrt %90 : vector<16x1xf32>
    %92 = vector.broadcast %91 : vector<16x1xf32> to vector<16x32xf32>
    %93 = arith.mulf %88, %92 : vector<16x32xf32>
    %94 = vector.broadcast %73 : vector<1x32xf32> to vector<16x32xf32>
    %95 = arith.mulf %93, %94 : vector<16x32xf32>
    %96 = vector.broadcast %75 : vector<1x32xf32> to vector<16x32xf32>
    %97 = arith.addf %95, %96 : vector<16x32xf32>
    %c0_45 = arith.constant 0 : index
    %c0_46 = arith.constant 0 : index
    %c0_47 = arith.constant 0 : index
    %98 = vector.load %arg9[%c0_45, %c0_46, %c0_47] : memref<2x32x64xf32, #tpu.memory_space<vmem>>, vector<1x32x64xf32>
    %99 = vector.shape_cast %98 : vector<1x32x64xf32> to vector<32x64xf32>
    %cst_48 = arith.constant dense<0.000000e+00> : vector<16x64xf32>
    %100 = tpu.matmul %97, %99, %cst_48 {dimension_numbers = #tpu.dot_dimension_numbers<[1], [0], [0], [1], [0, 0, 1, 1], [], []>} : vector<16x32xf32>, vector<32x64xf32>, vector<16x64xf32> -> vector<16x64xf32>
    %c0_49 = arith.constant 0 : index
    %c0_50 = arith.constant 0 : index
    %c0_51 = arith.constant 0 : index
    %101 = vector.load %arg10[%c0_49, %c0_50, %c0_51] : memref<2x1x64xf32, #tpu.memory_space<vmem>>, vector<1x1x64xf32>
    %102 = vector.shape_cast %101 : vector<1x1x64xf32> to vector<1x64xf32>
    %103 = vector.broadcast %102 : vector<1x64xf32> to vector<16x64xf32>
    %104 = arith.addf %100, %103 : vector<16x64xf32>
    %cst_52 = arith.constant 5.000000e-01 : f32
    %105 = vector.broadcast %cst_52 : f32 to vector<16x64xf32>
    %106 = arith.mulf %105, %104 : vector<16x64xf32>
    %cst_53 = arith.constant 4.471500e-02 : f32
    %107 = vector.broadcast %cst_53 : f32 to vector<16x64xf32>
    %108 = arith.mulf %107, %104 : vector<16x64xf32>
    %109 = arith.mulf %108, %104 : vector<16x64xf32>
    %110 = arith.mulf %109, %104 : vector<16x64xf32>
    %111 = arith.addf %104, %110 : vector<16x64xf32>
    %cst_54 = arith.constant 0.797884583 : f32
    %112 = vector.broadcast %cst_54 : f32 to vector<16x64xf32>
    %113 = arith.mulf %112, %111 : vector<16x64xf32>
    %114 = math.tanh %113 : vector<16x64xf32>
    %cst_55 = arith.constant 1.000000e+00 : f32
    %115 = vector.broadcast %cst_55 : f32 to vector<16x64xf32>
    %116 = arith.addf %115, %114 : vector<16x64xf32>
    %117 = arith.mulf %106, %116 : vector<16x64xf32>
    %c0_56 = arith.constant 0 : index
    %c0_57 = arith.constant 0 : index
    %c0_58 = arith.constant 0 : index
    %118 = vector.load %arg11[%c0_56, %c0_57, %c0_58] : memref<2x64x32xf32, #tpu.memory_space<vmem>>, vector<1x64x32xf32>
    %119 = vector.shape_cast %118 : vector<1x64x32xf32> to vector<64x32xf32>
    %cst_59 = arith.constant dense<0.000000e+00> : vector<16x32xf32>
    %120 = tpu.matmul %117, %119, %cst_59 {dimension_numbers = #tpu.dot_dimension_numbers<[1], [0], [0], [1], [0, 0, 1, 1], [], []>} : vector<16x64xf32>, vector<64x32xf32>, vector<16x32xf32> -> vector<16x32xf32>
    %c0_60 = arith.constant 0 : index
    %c0_61 = arith.constant 0 : index
    %c0_62 = arith.constant 0 : index
    %121 = vector.load %arg12[%c0_60, %c0_61, %c0_62] : memref<2x1x32xf32, #tpu.memory_space<vmem>>, vector<1x1x32xf32>
    %122 = vector.shape_cast %121 : vector<1x1x32xf32> to vector<1x32xf32>
    %123 = vector.broadcast %122 : vector<1x32xf32> to vector<16x32xf32>
    %124 = arith.addf %120, %123 : vector<16x32xf32>
    %125 = arith.addf %97, %124 : vector<16x32xf32>
    %c0_63 = arith.constant 0 : index
    %c0_64 = arith.constant 0 : index
    %c0_65 = arith.constant 0 : index
    %126 = vector.load %arg13[%c0_63, %c0_64, %c0_65] : memref<2x1x32xf32, #tpu.memory_space<vmem>>, vector<1x1x32xf32>
    %127 = vector.shape_cast %126 : vector<1x1x32xf32> to vector<1x32xf32>
    %c0_66 = arith.constant 0 : index
    %c0_67 = arith.constant 0 : index
    %c0_68 = arith.constant 0 : index
    %128 = vector.load %arg14[%c0_66, %c0_67, %c0_68] : memref<2x1x32xf32, #tpu.memory_space<vmem>>, vector<1x1x32xf32>
    %129 = vector.shape_cast %128 : vector<1x1x32xf32> to vector<1x32xf32>
    %cst_69 = arith.constant dense<0.000000e+00> : vector<16xf32>
    %130 = vector.multi_reduction <add>, %125, %cst_69 [1] : vector<16x32xf32> to vector<16xf32>
    %131 = vector.shape_cast %130 : vector<16xf32> to vector<16x1xf32>
    %cst_70 = arith.constant 3.200000e+01 : f32
    %132 = vector.broadcast %cst_70 : f32 to vector<16x1xf32>
    %133 = arith.divf %131, %132 : vector<16x1xf32>
    %134 = vector.broadcast %133 : vector<16x1xf32> to vector<16x32xf32>
    %135 = arith.subf %125, %134 : vector<16x32xf32>
    %136 = arith.mulf %135, %135 : vector<16x32xf32>
    %cst_71 = arith.constant dense<0.000000e+00> : vector<16xf32>
    %137 = vector.multi_reduction <add>, %136, %cst_71 [1] : vector<16x32xf32> to vector<16xf32>
    %138 = vector.shape_cast %137 : vector<16xf32> to vector<16x1xf32>
    %cst_72 = arith.constant 3.200000e+01 : f32
    %139 = vector.broadcast %cst_72 : f32 to vector<16x1xf32>
    %140 = arith.divf %138, %139 : vector<16x1xf32>
    %141 = vector.broadcast %133 : vector<16x1xf32> to vector<16x32xf32>
    %142 = arith.subf %125, %141 : vector<16x32xf32>
    %cst_73 = arith.constant 9.99999996E-13 : f32
    %143 = vector.broadcast %cst_73 : f32 to vector<16x1xf32>
    %144 = arith.addf %140, %143 : vector<16x1xf32>
    %145 = math.rsqrt %144 : vector<16x1xf32>
    %146 = vector.broadcast %145 : vector<16x1xf32> to vector<16x32xf32>
    %147 = arith.mulf %142, %146 : vector<16x32xf32>
    %148 = vector.broadcast %127 : vector<1x32xf32> to vector<16x32xf32>
    %149 = arith.mulf %147, %148 : vector<16x32xf32>
    %150 = vector.broadcast %129 : vector<1x32xf32> to vector<16x32xf32>
    %151 = arith.addf %149, %150 : vector<16x32xf32>
    %c1 = arith.constant 1 : index
    %c0_74 = arith.constant 0 : index
    %c0_75 = arith.constant 0 : index
    %152 = vector.load %arg3[%c1, %c0_74, %c0_75] : memref<2x32x96xf32, #tpu.memory_space<vmem>>, vector<1x32x96xf32>
    %153 = vector.shape_cast %152 : vector<1x32x96xf32> to vector<32x96xf32>
    %cst_76 = arith.constant dense<0.000000e+00> : vector<16x96xf32>
    %154 = tpu.matmul %151, %153, %cst_76 {dimension_numbers = #tpu.dot_dimension_numbers<[1], [0], [0], [1], [0, 0, 1, 1], [], []>} : vector<16x32xf32>, vector<32x96xf32>, vector<16x96xf32> -> vector<16x96xf32>
    %c1_77 = arith.constant 1 : index
    %c0_78 = arith.constant 0 : index
    %c0_79 = arith.constant 0 : index
    %155 = vector.load %arg4[%c1_77, %c0_78, %c0_79] : memref<2x1x96xf32, #tpu.memory_space<vmem>>, vector<1x1x96xf32>
    %156 = vector.shape_cast %155 : vector<1x1x96xf32> to vector<1x96xf32>
    %157 = vector.broadcast %156 : vector<1x96xf32> to vector<16x96xf32>
    %158 = arith.addf %154, %157 : vector<16x96xf32>
    %159 = vector.extract_strided_slice %158 {offsets = [0, 0], sizes = [16, 32], strides = [1, 1]} : vector<16x96xf32> to vector<16x32xf32>
    %160 = vector.shape_cast %159 : vector<16x32xf32> to vector<2x8x32xf32>
    %161 = vector.extract_strided_slice %158 {offsets = [0, 32], sizes = [16, 32], strides = [1, 1]} : vector<16x96xf32> to vector<16x32xf32>
    %162 = vector.shape_cast %161 : vector<16x32xf32> to vector<2x8x32xf32>
    %163 = vector.extract_strided_slice %158 {offsets = [0, 64], sizes = [16, 32], strides = [1, 1]} : vector<16x96xf32> to vector<16x32xf32>
    %164 = vector.shape_cast %163 : vector<16x32xf32> to vector<2x8x32xf32>
    %165 = vector.extract_strided_slice %160 {offsets = [0, 0, 0], sizes = [2, 8, 16], strides = [1, 1, 1]} : vector<2x8x32xf32> to vector<2x8x16xf32>
    %166 = vector.extract_strided_slice %162 {offsets = [0, 0, 0], sizes = [2, 8, 16], strides = [1, 1, 1]} : vector<2x8x32xf32> to vector<2x8x16xf32>
    %167 = vector.extract_strided_slice %164 {offsets = [0, 0, 0], sizes = [2, 8, 16], strides = [1, 1, 1]} : vector<2x8x32xf32> to vector<2x8x16xf32>
    "tpu.trace_start"() <{level = 10 : i32, message = "bsd,btd->bst"}> : () -> ()
    %cst_80 = arith.constant dense<0.000000e+00> : vector<2x8x8xf32>
    %168 = tpu.matmul %165, %166, %cst_80 {dimension_numbers = #tpu.dot_dimension_numbers<[2], [2], [1], [1], [0, 0, 0, 1, 1, 1], [0], [0]>} : vector<2x8x16xf32>, vector<2x8x16xf32>, vector<2x8x8xf32> -> vector<2x8x8xf32>
    "tpu.trace_stop"() : () -> ()
    %cst_81 = arith.constant 2.500000e-01 : f32
    %169 = vector.broadcast %cst_81 : f32 to vector<2x8x8xf32>
    %170 = arith.mulf %168, %169 : vector<2x8x8xf32>
    %171 = vector.broadcast %5 : vector<2x1x8xf32> to vector<2x8x8xf32>
    %172 = arith.addf %170, %171 : vector<2x8x8xf32>
    %cst_82 = arith.constant dense<0xFF800000> : vector<2x8xf32>
    %173 = vector.multi_reduction <maximumf>, %172, %cst_82 [2] : vector<2x8x8xf32> to vector<2x8xf32>
    %174 = vector.shape_cast %173 : vector<2x8xf32> to vector<2x8x1xf32>
    %175 = vector.broadcast %174 : vector<2x8x1xf32> to vector<2x8x8xf32>
    %176 = arith.subf %172, %175 : vector<2x8x8xf32>
    %177 = math.exp %176 : vector<2x8x8xf32>
    %cst_83 = arith.constant dense<0.000000e+00> : vector<2x8xf32>
    %178 = vector.multi_reduction <add>, %177, %cst_83 [2] : vector<2x8x8xf32> to vector<2x8xf32>
    %179 = vector.shape_cast %178 : vector<2x8xf32> to vector<2x8x1xf32>
    %180 = tpu.reciprocal %179 {approx = true} : vector<2x8x1xf32> -> vector<2x8x1xf32>
    %181 = vector.broadcast %180 : vector<2x8x1xf32> to vector<2x8x8xf32>
    %182 = arith.mulf %177, %181 : vector<2x8x8xf32>
    "tpu.trace_start"() <{level = 10 : i32, message = "bst,btd->bsd"}> : () -> ()
    %cst_84 = arith.constant dense<0.000000e+00> : vector<2x8x16xf32>
    %183 = tpu.matmul %182, %167, %cst_84 {dimension_numbers = #tpu.dot_dimension_numbers<[2], [1], [1], [2], [0, 0, 0, 1, 1, 2], [0], [0]>} : vector<2x8x8xf32>, vector<2x8x16xf32>, vector<2x8x16xf32> -> vector<2x8x16xf32>
    "tpu.trace_stop"() : () -> ()
    %184 = vector.shape_cast %183 : vector<2x8x16xf32> to vector<16x16xf32>
    %c0_85 = arith.constant 0 : index
    %c0_86 = arith.constant 0 : index
    %185 = vector.load %arg17[%c0_85, %c0_86] : memref<16x32xf32, #tpu.memory_space<vmem>>, vector<16x16xf32>
    tpu.vector_store %arg17[%c0_85, %c0_86], %184 {strides = array<i32>} : memref<16x32xf32, #tpu.memory_space<vmem>>, vector<16x16xf32>,
    %186 = vector.extract_strided_slice %160 {offsets = [0, 0, 16], sizes = [2, 8, 16], strides = [1, 1, 1]} : vector<2x8x32xf32> to vector<2x8x16xf32>
    %187 = vector.extract_strided_slice %162 {offsets = [0, 0, 16], sizes = [2, 8, 16], strides = [1, 1, 1]} : vector<2x8x32xf32> to vector<2x8x16xf32>
    %188 = vector.extract_strided_slice %164 {offsets = [0, 0, 16], sizes = [2, 8, 16], strides = [1, 1, 1]} : vector<2x8x32xf32> to vector<2x8x16xf32>
    "tpu.trace_start"() <{level = 10 : i32, message = "bsd,btd->bst"}> : () -> ()
    %cst_87 = arith.constant dense<0.000000e+00> : vector<2x8x8xf32>
    %189 = tpu.matmul %186, %187, %cst_87 {dimension_numbers = #tpu.dot_dimension_numbers<[2], [2], [1], [1], [0, 0, 0, 1, 1, 1], [0], [0]>} : vector<2x8x16xf32>, vector<2x8x16xf32>, vector<2x8x8xf32> -> vector<2x8x8xf32>
    "tpu.trace_stop"() : () -> ()
    %cst_88 = arith.constant 2.500000e-01 : f32
    %190 = vector.broadcast %cst_88 : f32 to vector<2x8x8xf32>
    %191 = arith.mulf %189, %190 : vector<2x8x8xf32>
    %192 = vector.broadcast %5 : vector<2x1x8xf32> to vector<2x8x8xf32>
    %193 = arith.addf %191, %192 : vector<2x8x8xf32>
    %cst_89 = arith.constant dense<0xFF800000> : vector<2x8xf32>
    %194 = vector.multi_reduction <maximumf>, %193, %cst_89 [2] : vector<2x8x8xf32> to vector<2x8xf32>
    %195 = vector.shape_cast %194 : vector<2x8xf32> to vector<2x8x1xf32>
    %196 = vector.broadcast %195 : vector<2x8x1xf32> to vector<2x8x8xf32>
    %197 = arith.subf %193, %196 : vector<2x8x8xf32>
    %198 = math.exp %197 : vector<2x8x8xf32>
    %cst_90 = arith.constant dense<0.000000e+00> : vector<2x8xf32>
    %199 = vector.multi_reduction <add>, %198, %cst_90 [2] : vector<2x8x8xf32> to vector<2x8xf32>
    %200 = vector.shape_cast %199 : vector<2x8xf32> to vector<2x8x1xf32>
    %201 = tpu.reciprocal %200 {approx = true} : vector<2x8x1xf32> -> vector<2x8x1xf32>
    %202 = vector.broadcast %201 : vector<2x8x1xf32> to vector<2x8x8xf32>
    %203 = arith.mulf %198, %202 : vector<2x8x8xf32>
    "tpu.trace_start"() <{level = 10 : i32, message = "bst,btd->bsd"}> : () -> ()
    %cst_91 = arith.constant dense<0.000000e+00> : vector<2x8x16xf32>
    %204 = tpu.matmul %203, %188, %cst_91 {dimension_numbers = #tpu.dot_dimension_numbers<[2], [1], [1], [2], [0, 0, 0, 1, 1, 2], [0], [0]>} : vector<2x8x8xf32>, vector<2x8x16xf32>, vector<2x8x16xf32> -> vector<2x8x16xf32>
    "tpu.trace_stop"() : () -> ()
    %205 = vector.shape_cast %204 : vector<2x8x16xf32> to vector<16x16xf32>
    %c0_92 = arith.constant 0 : index
    %c16_93 = arith.constant 16 : index
    %206 = vector.load %arg17[%c0_92, %c16_93] : memref<16x32xf32, #tpu.memory_space<vmem>>, vector<16x16xf32>
    tpu.vector_store %arg17[%c0_92, %c16_93], %205 {strides = array<i32>} : memref<16x32xf32, #tpu.memory_space<vmem>>, vector<16x16xf32>,
    %c0_94 = arith.constant 0 : index
    %c0_95 = arith.constant 0 : index
    %207 = vector.load %arg17[%c0_94, %c0_95] : memref<16x32xf32, #tpu.memory_space<vmem>>, vector<16x32xf32>
    %c1_96 = arith.constant 1 : index
    %c0_97 = arith.constant 0 : index
    %c0_98 = arith.constant 0 : index
    %208 = vector.load %arg5[%c1_96, %c0_97, %c0_98] : memref<2x32x32xf32, #tpu.memory_space<vmem>>, vector<1x32x32xf32>
    %209 = vector.shape_cast %208 : vector<1x32x32xf32> to vector<32x32xf32>
    %cst_99 = arith.constant dense<0.000000e+00> : vector<16x32xf32>
    %210 = tpu.matmul %207, %209, %cst_99 {dimension_numbers = #tpu.dot_dimension_numbers<[1], [0], [0], [1], [0, 0, 1, 1], [], []>} : vector<16x32xf32>, vector<32x32xf32>, vector<16x32xf32> -> vector<16x32xf32>
    %c1_100 = arith.constant 1 : index
    %c0_101 = arith.constant 0 : index
    %c0_102 = arith.constant 0 : index
    %211 = vector.load %arg6[%c1_100, %c0_101, %c0_102] : memref<2x1x32xf32, #tpu.memory_space<vmem>>, vector<1x1x32xf32>
    %212 = vector.shape_cast %211 : vector<1x1x32xf32> to vector<1x32xf32>
    %213 = vector.broadcast %212 : vector<1x32xf32> to vector<16x32xf32>
    %214 = arith.addf %210, %213 : vector<16x32xf32>
    %215 = arith.addf %151, %214 : vector<16x32xf32>
    %c1_103 = arith.constant 1 : index
    %c0_104 = arith.constant 0 : index
    %c0_105 = arith.constant 0 : index
    %216 = vector.load %arg7[%c1_103, %c0_104, %c0_105] : memref<2x1x32xf32, #tpu.memory_space<vmem>>, vector<1x1x32xf32>
    %217 = vector.shape_cast %216 : vector<1x1x32xf32> to vector<1x32xf32>
    %c1_106 = arith.constant 1 : index
    %c0_107 = arith.constant 0 : index
    %c0_108 = arith.constant 0 : index
    %218 = vector.load %arg8[%c1_106, %c0_107, %c0_108] : memref<2x1x32xf32, #tpu.memory_space<vmem>>, vector<1x1x32xf32>
    %219 = vector.shape_cast %218 : vector<1x1x32xf32> to vector<1x32xf32>
    %cst_109 = arith.constant dense<0.000000e+00> : vector<16xf32>
    %220 = vector.multi_reduction <add>, %215, %cst_109 [1] : vector<16x32xf32> to vector<16xf32>
    %221 = vector.shape_cast %220 : vector<16xf32> to vector<16x1xf32>
    %cst_110 = arith.constant 3.200000e+01 : f32
    %222 = vector.broadcast %cst_110 : f32 to vector<16x1xf32>
    %223 = arith.divf %221, %222 : vector<16x1xf32>
    %224 = vector.broadcast %223 : vector<16x1xf32> to vector<16x32xf32>
    %225 = arith.subf %215, %224 : vector<16x32xf32>
    %226 = arith.mulf %225, %225 : vector<16x32xf32>
    %cst_111 = arith.constant dense<0.000000e+00> : vector<16xf32>
    %227 = vector.multi_reduction <add>, %226, %cst_111 [1] : vector<16x32xf32> to vector<16xf32>
    %228 = vector.shape_cast %227 : vector<16xf32> to vector<16x1xf32>
    %cst_112 = arith.constant 3.200000e+01 : f32
    %229 = vector.broadcast %cst_112 : f32 to vector<16x1xf32>
    %230 = arith.divf %228, %229 : vector<16x1xf32>
    %231 = vector.broadcast %223 : vector<16x1xf32> to vector<16x32xf32>
    %232 = arith.subf %215, %231 : vector<16x32xf32>
    %cst_113 = arith.constant 9.99999996E-13 : f32
    %233 = vector.broadcast %cst_113 : f32 to vector<16x1xf32>
    %234 = arith.addf %230, %233 : vector<16x1xf32>
    %235 = math.rsqrt %234 : vector<16x1xf32>
    %236 = vector.broadcast %235 : vector<16x1xf32> to vector<16x32xf32>
    %237 = arith.mulf %232, %236 : vector<16x32xf32>
    %238 = vector.broadcast %217 : vector<1x32xf32> to vector<16x32xf32>
    %239 = arith.mulf %237, %238 : vector<16x32xf32>
    %240 = vector.broadcast %219 : vector<1x32xf32> to vector<16x32xf32>
    %241 = arith.addf %239, %240 : vector<16x32xf32>
    %c1_114 = arith.constant 1 : index
    %c0_115 = arith.constant 0 : index
    %c0_116 = arith.constant 0 : index
    %242 = vector.load %arg9[%c1_114, %c0_115, %c0_116] : memref<2x32x64xf32, #tpu.memory_space<vmem>>, vector<1x32x64xf32>
    %243 = vector.shape_cast %242 : vector<1x32x64xf32> to vector<32x64xf32>
    %cst_117 = arith.constant dense<0.000000e+00> : vector<16x64xf32>
    %244 = tpu.matmul %241, %243, %cst_117 {dimension_numbers = #tpu.dot_dimension_numbers<[1], [0], [0], [1], [0, 0, 1, 1], [], []>} : vector<16x32xf32>, vector<32x64xf32>, vector<16x64xf32> -> vector<16x64xf32>
    %c1_118 = arith.constant 1 : index
    %c0_119 = arith.constant 0 : index
    %c0_120 = arith.constant 0 : index
    %245 = vector.load %arg10[%c1_118, %c0_119, %c0_120] : memref<2x1x64xf32, #tpu.memory_space<vmem>>, vector<1x1x64xf32>
    %246 = vector.shape_cast %245 : vector<1x1x64xf32> to vector<1x64xf32>
    %247 = vector.broadcast %246 : vector<1x64xf32> to vector<16x64xf32>
    %248 = arith.addf %244, %247 : vector<16x64xf32>
    %cst_121 = arith.constant 5.000000e-01 : f32
    %249 = vector.broadcast %cst_121 : f32 to vector<16x64xf32>
    %250 = arith.mulf %249, %248 : vector<16x64xf32>
    %cst_122 = arith.constant 4.471500e-02 : f32
    %251 = vector.broadcast %cst_122 : f32 to vector<16x64xf32>
    %252 = arith.mulf %251, %248 : vector<16x64xf32>
    %253 = arith.mulf %252, %248 : vector<16x64xf32>
    %254 = arith.mulf %253, %248 : vector<16x64xf32>
    %255 = arith.addf %248, %254 : vector<16x64xf32>
    %cst_123 = arith.constant 0.797884583 : f32
    %256 = vector.broadcast %cst_123 : f32 to vector<16x64xf32>
    %257 = arith.mulf %256, %255 : vector<16x64xf32>
    %258 = math.tanh %257 : vector<16x64xf32>
    %cst_124 = arith.constant 1.000000e+00 : f32
    %259 = vector.broadcast %cst_124 : f32 to vector<16x64xf32>
    %260 = arith.addf %259, %258 : vector<16x64xf32>
    %261 = arith.mulf %250, %260 : vector<16x64xf32>
    %c1_125 = arith.constant 1 : index
    %c0_126 = arith.constant 0 : index
    %c0_127 = arith.constant 0 : index
    %262 = vector.load %arg11[%c1_125, %c0_126, %c0_127] : memref<2x64x32xf32, #tpu.memory_space<vmem>>, vector<1x64x32xf32>
    %263 = vector.shape_cast %262 : vector<1x64x32xf32> to vector<64x32xf32>
    %cst_128 = arith.constant dense<0.000000e+00> : vector<16x32xf32>
    %264 = tpu.matmul %261, %263, %cst_128 {dimension_numbers = #tpu.dot_dimension_numbers<[1], [0], [0], [1], [0, 0, 1, 1], [], []>} : vector<16x64xf32>, vector<64x32xf32>, vector<16x32xf32> -> vector<16x32xf32>
    %c1_129 = arith.constant 1 : index
    %c0_130 = arith.constant 0 : index
    %c0_131 = arith.constant 0 : index
    %265 = vector.load %arg12[%c1_129, %c0_130, %c0_131] : memref<2x1x32xf32, #tpu.memory_space<vmem>>, vector<1x1x32xf32>
    %266 = vector.shape_cast %265 : vector<1x1x32xf32> to vector<1x32xf32>
    %267 = vector.broadcast %266 : vector<1x32xf32> to vector<16x32xf32>
    %268 = arith.addf %264, %267 : vector<16x32xf32>
    %269 = arith.addf %241, %268 : vector<16x32xf32>
    %c1_132 = arith.constant 1 : index
    %c0_133 = arith.constant 0 : index
    %c0_134 = arith.constant 0 : index
    %270 = vector.load %arg13[%c1_132, %c0_133, %c0_134] : memref<2x1x32xf32, #tpu.memory_space<vmem>>, vector<1x1x32xf32>
    %271 = vector.shape_cast %270 : vector<1x1x32xf32> to vector<1x32xf32>
    %c1_135 = arith.constant 1 : index
    %c0_136 = arith.constant 0 : index
    %c0_137 = arith.constant 0 : index
    %272 = vector.load %arg14[%c1_135, %c0_136, %c0_137] : memref<2x1x32xf32, #tpu.memory_space<vmem>>, vector<1x1x32xf32>
    %273 = vector.shape_cast %272 : vector<1x1x32xf32> to vector<1x32xf32>
    %cst_138 = arith.constant dense<0.000000e+00> : vector<16xf32>
    %274 = vector.multi_reduction <add>, %269, %cst_138 [1] : vector<16x32xf32> to vector<16xf32>
    %275 = vector.shape_cast %274 : vector<16xf32> to vector<16x1xf32>
    %cst_139 = arith.constant 3.200000e+01 : f32
    %276 = vector.broadcast %cst_139 : f32 to vector<16x1xf32>
    %277 = arith.divf %275, %276 : vector<16x1xf32>
    %278 = vector.broadcast %277 : vector<16x1xf32> to vector<16x32xf32>
    %279 = arith.subf %269, %278 : vector<16x32xf32>
    %280 = arith.mulf %279, %279 : vector<16x32xf32>
    %cst_140 = arith.constant dense<0.000000e+00> : vector<16xf32>
    %281 = vector.multi_reduction <add>, %280, %cst_140 [1] : vector<16x32xf32> to vector<16xf32>
    %282 = vector.shape_cast %281 : vector<16xf32> to vector<16x1xf32>
    %cst_141 = arith.constant 3.200000e+01 : f32
    %283 = vector.broadcast %cst_141 : f32 to vector<16x1xf32>
    %284 = arith.divf %282, %283 : vector<16x1xf32>
    %285 = vector.broadcast %277 : vector<16x1xf32> to vector<16x32xf32>
    %286 = arith.subf %269, %285 : vector<16x32xf32>
    %cst_142 = arith.constant 9.99999996E-13 : f32
    %287 = vector.broadcast %cst_142 : f32 to vector<16x1xf32>
    %288 = arith.addf %284, %287 : vector<16x1xf32>
    %289 = math.rsqrt %288 : vector<16x1xf32>
    %290 = vector.broadcast %289 : vector<16x1xf32> to vector<16x32xf32>
    %291 = arith.mulf %286, %290 : vector<16x32xf32>
    %292 = vector.broadcast %271 : vector<1x32xf32> to vector<16x32xf32>
    %293 = arith.mulf %291, %292 : vector<16x32xf32>
    %294 = vector.broadcast %273 : vector<1x32xf32> to vector<16x32xf32>
    %295 = arith.addf %293, %294 : vector<16x32xf32>
    %296 = vector.shape_cast %295 : vector<16x32xf32> to vector<2x8x32xf32>
    %c0_143 = arith.constant 0 : index
    %c0_144 = arith.constant 0 : index
    %c0_145 = arith.constant 0 : index
    %297 = vector.load %arg16[%c0_143, %c0_144, %c0_145] : memref<2x8x32xf32, #tpu.memory_space<vmem>>, vector<2x8x32xf32>
    tpu.vector_store %arg16[%c0_143, %c0_144, %c0_145], %296 {strides = array<i32>} : memref<2x8x32xf32, #tpu.memory_space<vmem>>, vector<2x8x32xf32>,
    %298 = vector.shape_cast %0 : vector<2x8xf32> to vector<2x8x1xf32>
    %299 = vector.broadcast %298 : vector<2x8x1xf32> to vector<2x8x32xf32>
    %300 = arith.mulf %296, %299 : vector<2x8x32xf32>
    %cst_146 = arith.constant dense<0.000000e+00> : vector<2x32xf32>
    %301 = vector.multi_reduction <add>, %300, %cst_146 [1] : vector<2x8x32xf32> to vector<2x32xf32>
    %cst_147 = arith.constant dense<0.000000e+00> : vector<2xf32>
    %302 = vector.multi_reduction <add>, %0, %cst_147 [1] : vector<2x8xf32> to vector<2xf32>
    %303 = vector.shape_cast %302 : vector<2xf32> to vector<2x1xf32>
    %cst_148 = arith.constant 9.99999971E-10 : f32
    %304 = vector.broadcast %cst_148 : f32 to vector<2x1xf32>
    %305 = arith.maximumf %303, %304 : vector<2x1xf32>
    %306 = tpu.reciprocal %305 {approx = true} : vector<2x1xf32> -> vector<2x1xf32>
    %307 = vector.broadcast %306 : vector<2x1xf32> to vector<2x32xf32>
    %308 = arith.mulf %301, %307 : vector<2x32xf32>
    %309 = arith.mulf %308, %308 : vector<2x32xf32>
    %cst_149 = arith.constant dense<0.000000e+00> : vector<2xf32>
    %310 = vector.multi_reduction <add>, %309, %cst_149 [1] : vector<2x32xf32> to vector<2xf32>
    %311 = vector.shape_cast %310 : vector<2xf32> to vector<2x1xf32>
    %312 = math.sqrt %311 : vector<2x1xf32>
    %cst_150 = arith.constant 9.99999996E-13 : f32
    %313 = vector.broadcast %cst_150 : f32 to vector<2x1xf32>
    %314 = arith.maximumf %312, %313 : vector<2x1xf32>
    %315 = vector.broadcast %314 : vector<2x1xf32> to vector<2x32xf32>
    %316 = arith.divf %308, %315 : vector<2x32xf32>
    %c0_151 = arith.constant 0 : index
    %c0_152 = arith.constant 0 : index
    %317 = vector.load %arg15[%c0_151, %c0_152] : memref<2x32xf32, #tpu.memory_space<vmem>>, vector<2x32xf32>
    tpu.vector_store %arg15[%c0_151, %c0_152], %316 {strides = array<i32>} : memref<2x32xf32, #tpu.memory_space<vmem>>, vector<2x32xf32>,
    return
  }
  func.func @transform_0(%arg0: i32) -> (i32, i32, i32) {
    %c0_i32 = arith.constant 0 : i32
    %c0_i32_0 = arith.constant 0 : i32
    %c0_i32_1 = arith.constant 0 : i32
    %c0_i32_2 = arith.constant 0 : i32
    return %c0_i32, %c0_i32_0, %c0_i32_1 : i32, i32, i32
  }
  func.func @transform_1(%arg0: i32) -> (i32, i32) {
    %c0_i32 = arith.constant 0 : i32
    %c0_i32_0 = arith.constant 0 : i32
    %c0_i32_1 = arith.constant 0 : i32
    return %c0_i32, %c0_i32_0 : i32, i32
  }
  func.func @transform_2(%arg0: i32) -> (i32, i32, i32) {
    %c0_i32 = arith.constant 0 : i32
    %c0_i32_0 = arith.constant 0 : i32
    %c0_i32_1 = arith.constant 0 : i32
    %c0_i32_2 = arith.constant 0 : i32
    return %c0_i32, %c0_i32_0, %c0_i32_1 : i32, i32, i32
  }
  func.func @transform_3(%arg0: i32) -> (i32, i32, i32) {
    %c0_i32 = arith.constant 0 : i32
    %c0_i32_0 = arith.constant 0 : i32
    %c0_i32_1 = arith.constant 0 : i32
    %c0_i32_2 = arith.constant 0 : i32
    return %c0_i32, %c0_i32_0, %c0_i32_1 : i32, i32, i32
  }
  func.func @transform_4(%arg0: i32) -> (i32, i32, i32) {
    %c0_i32 = arith.constant 0 : i32
    %c0_i32_0 = arith.constant 0 : i32
    %c0_i32_1 = arith.constant 0 : i32
    %c0_i32_2 = arith.constant 0 : i32
    return %c0_i32, %c0_i32_0, %c0_i32_1 : i32, i32, i32
  }
  func.func @transform_5(%arg0: i32) -> (i32, i32, i32) {
    %c0_i32 = arith.constant 0 : i32
    %c0_i32_0 = arith.constant 0 : i32
    %c0_i32_1 = arith.constant 0 : i32
    %c0_i32_2 = arith.constant 0 : i32
    return %c0_i32, %c0_i32_0, %c0_i32_1 : i32, i32, i32
  }
  func.func @transform_6(%arg0: i32) -> (i32, i32, i32) {
    %c0_i32 = arith.constant 0 : i32
    %c0_i32_0 = arith.constant 0 : i32
    %c0_i32_1 = arith.constant 0 : i32
    %c0_i32_2 = arith.constant 0 : i32
    return %c0_i32, %c0_i32_0, %c0_i32_1 : i32, i32, i32
  }
  func.func @transform_7(%arg0: i32) -> (i32, i32, i32) {
    %c0_i32 = arith.constant 0 : i32
    %c0_i32_0 = arith.constant 0 : i32
    %c0_i32_1 = arith.constant 0 : i32
    %c0_i32_2 = arith.constant 0 : i32
    return %c0_i32, %c0_i32_0, %c0_i32_1 : i32, i32, i32
  }
  func.func @transform_8(%arg0: i32) -> (i32, i32, i32) {
    %c0_i32 = arith.constant 0 : i32
    %c0_i32_0 = arith.constant 0 : i32
    %c0_i32_1 = arith.constant 0 : i32
    %c0_i32_2 = arith.constant 0 : i32
    return %c0_i32, %c0_i32_0, %c0_i32_1 : i32, i32, i32
  }
  func.func @transform_9(%arg0: i32) -> (i32, i32, i32) {
    %c0_i32 = arith.constant 0 : i32
    %c0_i32_0 = arith.constant 0 : i32
    %c0_i32_1 = arith.constant 0 : i32
    %c0_i32_2 = arith.constant 0 : i32
    return %c0_i32, %c0_i32_0, %c0_i32_1 : i32, i32, i32
  }
  func.func @transform_10(%arg0: i32) -> (i32, i32, i32) {
    %c0_i32 = arith.constant 0 : i32
    %c0_i32_0 = arith.constant 0 : i32
    %c0_i32_1 = arith.constant 0 : i32
    %c0_i32_2 = arith.constant 0 : i32
    return %c0_i32, %c0_i32_0, %c0_i32_1 : i32, i32, i32
  }
  func.func @transform_11(%arg0: i32) -> (i32, i32, i32) {
    %c0_i32 = arith.constant 0 : i32
    %c0_i32_0 = arith.constant 0 : i32
    %c0_i32_1 = arith.constant 0 : i32
    %c0_i32_2 = arith.constant 0 : i32
    return %c0_i32, %c0_i32_0, %c0_i32_1 : i32, i32, i32
  }
  func.func @transform_12(%arg0: i32) -> (i32, i32, i32) {
    %c0_i32 = arith.constant 0 : i32
    %c0_i32_0 = arith.constant 0 : i32
    %c0_i32_1 = arith.constant 0 : i32
    %c0_i32_2 = arith.constant 0 : i32
    return %c0_i32, %c0_i32_0, %c0_i32_1 : i32, i32, i32
  }
  func.func @transform_13(%arg0: i32) -> (i32, i32, i32) {
    %c0_i32 = arith.constant 0 : i32
    %c0_i32_0 = arith.constant 0 : i32
    %c0_i32_1 = arith.constant 0 : i32
    %c0_i32_2 = arith.constant 0 : i32
    return %c0_i32, %c0_i32_0, %c0_i32_1 : i32, i32, i32
  }
  func.func @transform_14(%arg0: i32) -> (i32, i32) {
    %c0_i32 = arith.constant 0 : i32
    %c0_i32_0 = arith.constant 0 : i32
    %c0_i32_1 = arith.constant 0 : i32
    return %c0_i32, %c0_i32_0 : i32, i32
  }
  func.func @transform_15(%arg0: i32) -> (i32, i32, i32) {
    %c0_i32 = arith.constant 0 : i32
    %c0_i32_0 = arith.constant 0 : i32
    %c0_i32_1 = arith.constant 0 : i32
    %c0_i32_2 = arith.constant 0 : i32
    return %c0_i32, %c0_i32_0, %c0_i32_1 : i32, i32, i32
  }
}

</mosaic_0001>

<bundles_post_ra>
// kernel: dual_encoder_forward.1
= control target key start
LH: loop header
LB: loop body
LE: loop exit
PB: predicated region body
PF: predicated region fallthrough
CT: control target
= control target key end

     0   :  { %21 = vsyncpa [#allocation4], 0  ;;  %vm90_vm0 = vcmask 261120   ;;  %s3534_s0 = inlined_call_operand.vmem [shape: f32[2,8,32], index: 0, kind: input, shape index: {}]   ;;  %s3535_s1 = inlined_call_operand.vmem [shape: f32[2,8], index: 1, kind: input, shape index: {}]   ;;  %s3536_s2 = inlined_call_operand.vmem [shape: f32[2,32,96], index: 2, kind: input, shape index: {}]   ;;  %s3537_s3 = inlined_call_operand.vmem [shape: f32[2,1,96], index: 3, kind: input, shape index: {}]   ;;  %s3538_s4 = inlined_call_operand.vmem [shape: f32[2,32,32], index: 4, kind: input, shape index: {}]   ;;  %s3539_s5 = inlined_call_operand.vmem [shape: f32[2,1,32], index: 5, kind: input, shape index: {}]   ;;  %s3540_s6 = inlined_call_operand.vmem [shape: f32[2,1,32], index: 6, kind: input, shape index: {}]   ;;  %s3541_s7 = inlined_call_operand.vmem [shape: f32[2,1,32], index: 7, kind: input, shape index: {}]   ;;  %s3542_s8 = inlined_call_operand.vmem [shape: f32[2,32,64], index: 8, kind: input, shape index: {}]   ;;  %s3543_s9 = inlined_call_operand.vmem [shape: f32[2,1,64], index: 9, kind: input, shape index: {}]   ;;  %s3544_s10 = inlined_call_operand.vmem [shape: f32[2,64,32], index: 10, kind: input, shape index: {}]   ;;  %s3545_s11 = inlined_call_operand.vmem [shape: f32[2,1,32], index: 11, kind: input, shape index: {}]   ;;  %s3546_s12 = inlined_call_operand.vmem [shape: f32[2,1,32], index: 12, kind: input, shape index: {}]   ;;  %s3547_s13 = inlined_call_operand.vmem [shape: f32[2,1,32], index: 13, kind: input, shape index: {}]   ;;  %s3548_s14 = inlined_call_operand.hbm [shape: f32[2,32], index: 14, kind: output, shape index: {0}]   ;;  %s3549_s15 = inlined_call_operand.hbm [shape: f32[2,8,32], index: 15, kind: output, shape index: {1}]  }
   0x1   :  { %v82_v0 = vld [vmem:[%s3536_s2 + $0x18] sm:$0xff]  ;;  %v81_v1 = vld [vmem:[%s3536_s2 + $0x10] sm:$0xff]  ;;  %v3119_v2 = vld [vmem:[%s3534_s0] sm:$0xff] }
   0x2   :  { %2711 = vmatprep.subr.mxu1 %v82_v0  ;;  %v80_v3 = vld [vmem:[%s3536_s2 + $0x8] sm:$0xff]  ;;  %2719 = vmatprep.mubr.msk.f32.mxu1 %vm90_vm0, %v3119_v2 }
   0x3   :  { %2712 = vmatpush3.msra.mxu1 %v82_v0 }
   0x4   :  { %22 = vsyncpa [#allocation6], 0  ;;  %2713 = vmatprep.subr.mxu1 %v81_v1  ;;  %v79_v4 = vld [vmem:[%s3536_s2] sm:$0xff]  ;;  %v3132_v5 = vld [vmem:[%s3534_s0 + $0x8] sm:$0xff]  ;;  %v3017_v6 = vmov 0.0   ;;  %vm3018_vm1 = vmmov 0   ;;  %v58_v16 = vlaneseq }
   0x5   :  { %2714 = vmatpush3.msra.mxu1 %v81_v1  ;;  %2732 = vmatprep.subr.mxu0 %v3017_v6  ;;  %v2539_v8 = vld [vmem:[%s3537_s3] ss:$0 sm:$0xff]  ;;  %s3019_s16 = smov 96   ;;  %vm175_vm2 = vcmask 130048   ;;  %v3020_v14 = vmov 1966171168  }
   0x6   :  { %2715 = vmatprep.subr.mxu1 %v80_v3  ;;  %2734 = vmatprep.mubr.msk.f32.mxu0 %vm3018_vm1, %v3017_v6  ;;  %v56_v15 = vunpack.c.l.s4 %v3020_v14  ;;  %v51_v17 = vld [vmem:[%s3535_s1] sm:$0x3]  ;;  %v3168_v20 = vshrl.u32 %v58_v16, 7  ;;  %vm341_vm3 = vcmask 64512   ;;  %s3021_s19 = smov 64   ;;  %s3022_s20 = smov 80  }
   0x7   :  { %2716 = vmatpush3.msra.mxu1 %v80_v3  ;;  %v52_v18 = vsub.f32 1.0, %v51_v17  ;;  %s3023_s21 = smov 112   ;;  %s3024_s22 = smov 48   ;;  %vm860_vm4 = vcmask 261248   ;;  %vm1129_vm5 = vcmask 523264   ;;  %vm2463_vm6 = vcmask 58368  }
   0x8   :  { %2717 = vmatprep.subr.mxu1 %v79_v4  ;;  %v57_v19 = vunpack.c.0.s8 %v56_v15  ;;  %v3172_v25 = vsub.s32 0, %v3168_v20  ;;  %s3025_s30 = smov 16   ;;  %vm2480_vm7 = vcmask 1041409   ;;  %vm2483_vm8 = vcmask 254976  }
   0x9   :  { %2718 = vmatpush3.msra.mxu1 %v79_v4  ;;  %v53_v21 = vmul.f32 -1e+09, %v52_v18 }
   0xa   :  { %2720 = vmatmul.mubr.msk.f32.vlgmr.msra.gmra.mxu1 %vm90_vm0, %v3132_v5  ;;  %2722 = vmatprep.subr.mxu1 %v3017_v6  ;;  %v60_v22 = vsub.s32 %v57_v19, %v3168_v20 }
   0xb   :  { %2724 = vmatprep.mubr.msk.f32.mxu1 %vm3018_vm1, %v3017_v6 }
   0xc   :  { %v61_v23 = vrot.slane %v53_v21, %v60_v22 }
   0xe   :  { %v69_v24 = vrot.slane %v61_v23, %v60_v22  ;;  %v62_v26 = vcombine.high %v61_v23, %v61_v23 }
  0x10   :  { %v3175_v27 = vrot.slane %v69_v24, %v3172_v25  ;;  %v76_v28 = vrot.slane %v62_v26, %v60_v22 }
  0x12   :  { %v3179_v33 = vrot.slane %v76_v28, %v3172_v25 }
  0xca   :  { %v2721_v7 = vpop.f32.mrf.mxu1 }
  0xcb   :  { %v3149_v11 = vadd.f32 %v2721_v7, %v2539_v8 }
  0xcc   :  { %v163_v9 = vpop.f32.mrf.mxu1 }
  0xcd   :  { %v3145_v10 = vadd.f32 %v2539_v8, %v163_v9 }
  0xcf   :  { %173 = vrot.lane.b32.xlu0 %v3145_v10, %s3019_s16 }
  0xd3   :  { %251 = vrot.lane.b32.xlu0 %v3149_v11, %s3019_s16 }
 0x141   :  { %v174_v12 = vpop.permute.xlu0 %173 }
 0x142   :  { %2723 = vmatpush3.xpose.msk.msra.mxu1 %vm175_vm2, %v174_v12 }
 0x143   :  { %2727 = vmatprep.subr.mxu1 %v3017_v6 }
 0x145   :  { %2725 = vmatmul.mubr.msk.f32.vlgmr.msra.gmra.mxu1 %vm175_vm2, %v3145_v10  ;;  %v252_v13 = vpop.permute.xlu0 %251 }
 0x146   :  { %2728 = vmatpush3.xpose.msk.msra.mxu1 %vm175_vm2, %v252_v13  ;;  %2729 = vmatprep.mubr.msk.f32.mxu1 %vm3018_vm1, %v3017_v6 }
 0x147   :  { %2737 = vmatprep.subr.mxu1 %v3017_v6 }
 0x149   :  { %2730 = vmatmul.mubr.msk.f32.vlgmr.msra.gmra.mxu1 %vm175_vm2, %v3149_v11 }
 0x14a   :  { %2739 = vmatprep.mubr.msk.f32.mxu1 %vm3018_vm1, %v3017_v6 }
 0x205   :  { %v246_v29 = vpop.f32.mrf.mxu1 }
 0x206   :  { %v327_v30 = vmul.f32 0.25, %v246_v29 }
 0x207   :  { %v2726_v31 = vpop.f32.mrf.mxu1 }
 0x208   :  { %v339_v32 = vadd.f32 %v3175_v27, %v327_v30 }
 0x209   :  { %v323_v34 = vpop.f32.mrf.mxu1 }
 0x20a   :  { %v328_v35 = vmul.f32 0.25, %v323_v34  ;;  %v342_v36 = vsel %vm341_vm3, %v339_v32, -inf }
 0x20b   :  { %v2731_v37 = vpop.f32.mrf.mxu1  ;;  %343 = vmax.xlane.f32.xlu1 %v342_v36 }
 0x20c   :  { %v340_v38 = vadd.f32 %v3179_v33, %v328_v35 }
 0x20e   :  { %v345_v39 = vsel %vm341_vm3, %v340_v38, -inf }
 0x20f   :  { %346 = vmax.xlane.f32.xlu1 %v345_v39  ;;  %v866_v39 = vld [vmem:[%s3538_s4 + $0x8] sm:$0xff] }
 0x220   :  { %364 = vrot.lane.b32.xlu1 %v3145_v10, %s3021_s19 }
 0x224   :  { %440 = vrot.lane.b32.xlu1 %v3149_v11, %s3021_s19 }
 0x228   :  { %520 = vrot.lane.b32.xlu1 %v3145_v10, %s3022_s20 }
 0x22c   :  { %598 = vrot.lane.b32.xlu1 %v3149_v11, %s3022_s20 }
 0x294   :  { %v344_v40 = vpop.xlane.xlu1 %343 }
 0x295   :  { %v348_v41 = vsub.f32 %v339_v32, %v344_v40  ;;  %v865_v40 = vld [vmem:[%s3538_s4] sm:$0xff] }
 0x297   :  { %v350_v42 = vmul.f32 1.442695, %v348_v41 }
 0x298   :  { %v347_v43 = vpop.xlane.xlu1 %346 }
 0x299   :  { %2908 = vpow2.f32 %v350_v42  ;;  %v349_v44 = vsub.f32 %v340_v38, %v347_v43  ;;  %v868_v38 = vld [vmem:[%s3538_s4 + $0x18] sm:$0xff] }
 0x29b   :  { %v352_v45 = vmul.f32 1.442695, %v349_v44 }
 0x29c   :  { %v365_v46 = vpop.permute.xlu1 %364 }
 0x29d   :  { %2910 = vpow2.f32 %v352_v45  ;;  %2733 = vmatpush3.msra.mxu0 %v365_v46 }
 0x29e   :  { %2742 = vmatprep.subr.mxu0 %v3017_v6 }
 0x2a0   :  { %v441_v47 = vpop.permute.xlu1 %440 }
 0x2a1   :  { %2738 = vmatpush3.msra.mxu1 %v441_v47 }
 0x2a2   :  { %2747 = vmatprep.subr.mxu1 %v3017_v6 }
 0x2a4   :  { %v521_v52 = vpop.permute.xlu1 %520 }
 0x2a6   :  { %v2909_v48 = vpop.eup %2908 }
 0x2a7   :  { %v354_v49 = vsel %vm341_vm3, %v2909_v48, 0.0 }
 0x2a8   :  { %355 = vadd.xlane.f32.xlu0 %v354_v49  ;;  %v599_v53 = vpop.permute.xlu1 %598  ;;  %v2554_v49 = vld [vmem:[%s3539_s5] ss:$0 sm:$0xff] }
 0x2aa   :  { %v2911_v50 = vpop.eup %2910 }
 0x2ab   :  { %v357_v51 = vsel %vm341_vm3, %v2911_v50, 0.0 }
 0x2ac   :  { %358 = vadd.xlane.f32.xlu1 %v357_v51 }
 0x2bd   :  { %596 = vrot.lane.b32.xlu1 %v3149_v11, %s3023_s21 }
 0x2be   :  { %518 = vrot.lane.b32.xlu0 %v3145_v10, %s3023_s21 }
 0x331   :  { %v356_v54 = vpop.xlane.xlu0 %355 }
 0x332   :  { %2912 = vrcp.f32 %v356_v54 }
 0x335   :  { %v359_v55 = vpop.xlane.xlu1 %358  ;;  %v519_v60 = vpop.permute.xlu0 %518 }
 0x336   :  { %2914 = vrcp.f32 %v359_v55 }
 0x339   :  { %v597_v61 = vpop.permute.xlu1 %596 }
 0x33f   :  { %v2913_v56 = vpop.eup %2912 }
 0x340   :  { %v362_v57 = vmul.f32 %v2913_v56, %v2909_v48 }
 0x342   :  { %2735 = vmatmul.mubr.msk.f32.vlgmr.msra.gmra.mxu0 %vm341_vm3, %v362_v57 }
 0x343   :  { %v2915_v58 = vpop.eup %2914  ;;  %2743 = vmatpush3.xpose.msk.msra.mxu0 %vm175_vm2, %v521_v52  ;;  %2744 = vmatprep.mubr.msk.f32.mxu0 %vm3018_vm1, %v3017_v6 }
 0x344   :  { %v363_v59 = vmul.f32 %v2915_v58, %v2911_v50  ;;  %2752 = vmatprep.subr.mxu0 %v3017_v6 }
 0x346   :  { %2740 = vmatmul.mubr.msk.f32.vlgmr.msra.gmra.mxu1 %vm341_vm3, %v363_v59  ;;  %2745 = vmatmul.mubr.msk.f32.vlgmr.msra.gmra.mxu0 %vm175_vm2, %v519_v60 }
 0x347   :  { %2748 = vmatpush3.xpose.msk.msra.mxu1 %vm175_vm2, %v599_v53  ;;  %2749 = vmatprep.mubr.msk.f32.mxu1 %vm3018_vm1, %v3017_v6 }
 0x348   :  { %2757 = vmatprep.subr.mxu1 %v3017_v6  ;;  %2754 = vmatprep.mubr.msk.f32.mxu0 %vm3018_vm1, %v3017_v6 }
 0x34a   :  { %2750 = vmatmul.mubr.msk.f32.vlgmr.msra.gmra.mxu1 %vm175_vm2, %v597_v61 }
 0x34b   :  { %2759 = vmatprep.mubr.msk.f32.mxu1 %vm3018_vm1, %v3017_v6 }
 0x402   :  { %v436_v62 = vpop.f32.mrf.mxu0 }
 0x403   :  { %516 = vst.msk [vmem:[#allocation2] sm:$0xff] %vm175_vm2, %v436_v62 }
 0x404   :  { %v2736_v63 = vpop.f32.mrf.mxu0 }
 0x406   :  { %v512_v0 = vpop.f32.mrf.mxu1  ;;  %v592_v1 = vpop.f32.mrf.mxu0 }
 0x407   :  { %517 = vst.msk [vmem:[#allocation2 + $0x8] sm:$0xff] %vm175_vm2, %v512_v0  ;;  %v674_v3 = vmul.f32 0.25, %v592_v1 }
 0x408   :  { %v2741_v4 = vpop.f32.mrf.mxu1  ;;  %v2746_v7 = vpop.f32.mrf.mxu0 }
 0x409   :  { %v676_v8 = vadd.f32 %v674_v3, %v3175_v27  ;;  %v1006_v4 = vld [vmem:[%s3542_s8 + $0x10] sm:$0xff]  ;;  %v1005_v7 = vld [vmem:[%s3542_s8 + $0x8] sm:$0xff] }
 0x40a   :  { %v670_v9 = vpop.f32.mrf.mxu1 }
 0x40b   :  { %v675_v12 = vmul.f32 0.25, %v670_v9  ;;  %v678_v13 = vsel %vm341_vm3, %v676_v8, -inf }
 0x40c   :  { %679 = vmax.xlane.f32.xlu1 %v678_v13  ;;  %v2751_v14 = vpop.f32.mrf.mxu1 }
 0x40d   :  { %v677_v15 = vadd.f32 %v675_v12, %v3179_v33 }
 0x40f   :  { %v681_v16 = vsel %vm341_vm3, %v677_v15, -inf }
 0x410   :  { %682 = vmax.xlane.f32.xlu0 %v681_v16 }
 0x426   :  { %776 = vrot.lane.b32.xlu0 %v3149_v11, %s3024_s22 }
 0x495   :  { %v680_v17 = vpop.xlane.xlu1 %679 }
 0x496   :  { %v684_v18 = vsub.f32 %v676_v8, %v680_v17  ;;  %v1004_v8 = vld [vmem:[%s3542_s8] sm:$0xff] }
 0x498   :  { %v686_v19 = vmul.f32 1.442695, %v684_v18  ;;  %v2557_v18 = vld [vmem:[%s3540_s6] ss:$0 sm:$0xff] }
 0x499   :  { %v683_v21 = vpop.xlane.xlu0 %682 }
 0x49a   :  { %2916 = vpow2.f32 %v686_v19  ;;  %v685_v22 = vsub.f32 %v677_v15, %v683_v21  ;;  %v2558_v21 = vld [vmem:[%s3541_s7] ss:$0 sm:$0xff] }
 0x49c   :  { %v688_v23 = vmul.f32 1.442695, %v685_v22 }
 0x49d   :  { %v777_v24 = vpop.permute.xlu0 %776 }
 0x49e   :  { %2918 = vpow2.f32 %v688_v23  ;;  %2758 = vmatpush3.msra.mxu1 %v777_v24 }
 0x4a7   :  { %v2917_v26 = vpop.eup %2916 }
 0x4a8   :  { %v690_v28 = vsel %vm341_vm3, %v2917_v26, 0.0 }
 0x4a9   :  { %691 = vadd.xlane.f32.xlu1 %v690_v28 }
 0x4ab   :  { %v2919_v29 = vpop.eup %2918 }
 0x4ac   :  { %v693_v30 = vsel %vm341_vm3, %v2919_v29, 0.0 }
 0x4ad   :  { %694 = vadd.xlane.f32.xlu1 %v693_v30  ;;  %v1121_v30 = vld [vmem:[%s3544_s10 + $0x38] sm:$0xff] }
 0x4be   :  { %700 = vrot.lane.b32.xlu1 %v3145_v10, %s3024_s22  ;;  %v867_v10 = vld [vmem:[%s3538_s4 + $0x10] sm:$0xff] }
 0x532   :  { %v692_v11 = vpop.xlane.xlu1 %691 }
 0x533   :  { %2920 = vrcp.f32 %v692_v11  ;;  %v1120_v11 = vld [vmem:[%s3544_s10 + $0x30] sm:$0xff] }
 0x536   :  { %v695_v31 = vpop.xlane.xlu1 %694 }
 0x537   :  { %2922 = vrcp.f32 %v695_v31  ;;  %v1119_v31 = vld [vmem:[%s3544_s10 + $0x28] sm:$0xff] }
 0x53a   :  { %v701_v32 = vpop.permute.xlu1 %700 }
 0x53b   :  { %2753 = vmatpush3.msra.mxu0 %v701_v32  ;;  %v1118_v32 = vld [vmem:[%s3544_s10 + $0x20] sm:$0xff] }
 0x53c   :  { %2762 = vmatprep.subr.mxu0 %v868_v38 }
 0x540   :  { %v2921_v34 = vpop.eup %2920 }
 0x541   :  { %v698_v35 = vmul.f32 %v2921_v34, %v2917_v26  ;;  %v1117_v34 = vld [vmem:[%s3544_s10 + $0x18] sm:$0xff] }
 0x543   :  { %2755 = vmatmul.mubr.msk.f32.vlgmr.msra.gmra.mxu0 %vm341_vm3, %v698_v35  ;;  %v1116_v35 = vld [vmem:[%s3544_s10 + $0x10] sm:$0xff] }
 0x544   :  { %v2923_v36 = vpop.eup %2922  ;;  %2763 = vmatpush3.msra.mxu0 %v868_v38  ;;  %v2559_v38 = vld [vmem:[%s3543_s9] ss:$0 sm:$0xff] }
 0x545   :  { %v699_v37 = vmul.f32 %v2923_v36, %v2919_v29  ;;  %2764 = vmatprep.subr.mxu0 %v867_v10  ;;  %v1115_v36 = vld [vmem:[%s3544_s10 + $0x8] sm:$0xff] }
 0x546   :  { %2765 = vmatpush3.msra.mxu0 %v867_v10 }
 0x547   :  { %2760 = vmatmul.mubr.msk.f32.vlgmr.msra.gmra.mxu1 %vm341_vm3, %v699_v37  ;;  %2766 = vmatprep.subr.mxu0 %v866_v39  ;;  %v1114_v37 = vld [vmem:[%s3544_s10] sm:$0xff] }
 0x548   :  { %2767 = vmatpush3.msra.mxu0 %v866_v39 }
 0x549   :  { %2768 = vmatprep.subr.mxu0 %v865_v40 }
 0x54a   :  { %2769 = vmatpush3.msra.mxu0 %v865_v40 }
 0x54b   :  { %2784 = vmatprep.subr.mxu0 %v1121_v30 }
 0x603   :  { %v772_v41 = vpop.f32.mrf.mxu0 }
 0x604   :  { %854 = vrot.lane.b32.xlu1 %v772_v41, %s3025_s30 }
 0x605   :  { %v2756_v42 = vpop.f32.mrf.mxu0 }
 0x607   :  { %v848_v43 = vpop.f32.mrf.mxu1 }
 0x608   :  { %856 = vrot.lane.b32.xlu1 %v848_v43, %s3025_s30 }
 0x609   :  { %v2761_v44 = vpop.f32.mrf.mxu1 }
 0x676   :  { %v855_v45 = vpop.permute.xlu1 %854 }
 0x677   :  { %861 = vst.msk [vmem:[#allocation2] sm:$0xff] %vm860_vm4, %v855_v45 }
 0x67a   :  { %v857_v46 = vpop.permute.xlu1 %856 }
 0x67b   :  { %862 = vst.msk [vmem:[#allocation2 + $0x8] sm:$0xff] %vm860_vm4, %v857_v46 }
 0x67e   :  { %v863_v47 = vld [vmem:[#allocation2] sm:$0xff] }
 0x67f   :  { %2770 = vmatprep.mubr.msk.f32.mxu0 %vm90_vm0, %v863_v47 }
 0x682   :  { %v864_v48 = vld [vmem:[#allocation2 + $0x8] sm:$0xff] }
 0x683   :  { %2771 = vmatmul.mubr.msk.f32.vlgmr.msra.gmra.mxu0 %vm90_vm0, %v864_v48 }
 0x684   :  { %2785 = vmatpush3.msra.mxu0 %v1121_v30 }
 0x685   :  { %2786 = vmatprep.subr.mxu0 %v1120_v11 }
 0x686   :  { %2787 = vmatpush3.msra.mxu0 %v1120_v11 }
 0x687   :  { %2788 = vmatprep.subr.mxu0 %v1119_v31 }
 0x688   :  { %2789 = vmatpush3.msra.mxu0 %v1119_v31  ;;  %v2565_v31 = vld [vmem:[%s3546_s12] ss:$0 sm:$0xff] }
 0x689   :  { %2790 = vmatprep.subr.mxu0 %v1118_v32 }
 0x68a   :  { %2791 = vmatpush3.msra.mxu0 %v1118_v32 }
 0x68b   :  { %2792 = vmatprep.subr.mxu0 %v1117_v34 }
 0x68c   :  { %2793 = vmatpush3.msra.mxu0 %v1117_v34 }
 0x68d   :  { %2794 = vmatprep.subr.mxu0 %v1116_v35 }
 0x68e   :  { %2795 = vmatpush3.msra.mxu0 %v1116_v35 }
 0x68f   :  { %2796 = vmatprep.subr.mxu0 %v1115_v36 }
 0x690   :  { %2797 = vmatpush3.msra.mxu0 %v1115_v36 }
 0x691   :  { %2798 = vmatprep.subr.mxu0 %v1114_v37 }
 0x692   :  { %2799 = vmatpush3.msra.mxu0 %v1114_v37  ;;  %v2566_v37 = vld [vmem:[%s3547_s13] ss:$0 sm:$0xff] }
 0x693   :  { %2824 = vmatprep.subr.mxu0 %v3017_v6 }
 0x743   :  { %v2772_v50 = vpop.f32.mrf.mxu0 }
 0x744   :  { %v954_v51 = vadd.f32 %v2772_v50, %v2554_v49 }
 0x745   :  { %v948_v52 = vpop.f32.mrf.mxu0 }
 0x746   :  { %v949_v53 = vadd.f32 %v2554_v49, %v948_v52  ;;  %v958_v54 = vadd.f32 %v954_v51, %v3132_v5 }
 0x748   :  { %v964_v55 = vsel %vm90_vm0, %v958_v54, 0.0  ;;  %v957_v56 = vadd.f32 %v949_v53, %v3119_v2  ;;  %v1007_v2 = vld [vmem:[%s3542_s8 + $0x18] sm:$0xff] }
 0x749   :  { %965 = vadd.xlane.f32.xlu1 %v964_v55  ;;  %2773 = vmatprep.subr.mxu1 %v1007_v2 }
 0x74a   :  { %v961_v57 = vsel %vm90_vm0, %v957_v56, 0.0  ;;  %2774 = vmatpush3.msra.mxu1 %v1007_v2 }
 0x74b   :  { %962 = vadd.xlane.f32.xlu0 %v961_v57  ;;  %2775 = vmatprep.subr.mxu1 %v1006_v4 }
 0x74c   :  { %2776 = vmatpush3.msra.mxu1 %v1006_v4 }
 0x74d   :  { %2777 = vmatprep.subr.mxu1 %v1005_v7 }
 0x74e   :  { %2778 = vmatpush3.msra.mxu1 %v1005_v7 }
 0x74f   :  { %2779 = vmatprep.subr.mxu1 %v1004_v8 }
 0x750   :  { %2780 = vmatpush3.msra.mxu1 %v1004_v8 }
 0x7d2   :  { %v966_v58 = vpop.xlane.xlu1 %965 }
 0x7d3   :  { %v969_v59 = vmul.f32 0.03125, %v966_v58 }
 0x7d4   :  { %v963_v60 = vpop.xlane.xlu0 %962 }
 0x7d5   :  { %v968_v61 = vmul.f32 0.03125, %v963_v60  ;;  %v971_v62 = vsub.f32 %v958_v54, %v969_v59  ;;  %v2562_v60 = vld [vmem:[%s3545_s11] ss:$0 sm:$0xff] }
 0x7d7   :  { %v970_v63 = vsub.f32 %v957_v56, %v968_v61  ;;  %v973_v3 = vmul.f32 %v971_v62, %v971_v62 }
 0x7d9   :  { %v972_v0 = vmul.f32 %v970_v63, %v970_v63  ;;  %v977_v5 = vsel %vm90_vm0, %v973_v3, 0.0 }
 0x7db   :  { %v974_v1 = vsel %vm90_vm0, %v972_v0, 0.0 }
 0x7dc   :  { %975 = vadd.xlane.f32.xlu0 %v974_v1 }
 0x7e0   :  { %978 = vadd.xlane.f32.xlu0 %v977_v5 }
 0x865   :  { %v976_v9 = vpop.xlane.xlu0 %975 }
 0x866   :  { %v980_v12 = vmul.f32 0.03125, %v976_v9 }
 0x868   :  { %v982_v13 = vadd.f32 1e-12, %v980_v12 }
 0x869   :  { %v979_v14 = vpop.xlane.xlu0 %978 }
 0x86a   :  { %2924 = vrsqrt.f32 %v982_v13  ;;  %v981_v15 = vmul.f32 0.03125, %v979_v14 }
 0x86c   :  { %v983_v16 = vadd.f32 1e-12, %v981_v15 }
 0x86e   :  { %2926 = vrsqrt.f32 %v983_v16 }
 0x877   :  { %v2925_v17 = vpop.eup %2924 }
 0x878   :  { %v986_v19 = vmul.f32 %v2925_v17, %v970_v63 }
 0x87a   :  { %v994_v22 = vmul.f32 %v2557_v18, %v986_v19  ;;  %v2569_v19 = vld [vmem:[%s3536_s2 + $0x30] sm:$0xff] }
 0x87b   :  { %v2927_v23 = vpop.eup %2926 }
 0x87c   :  { %v987_v24 = vmul.f32 %v2927_v23, %v971_v62  ;;  %v3275_v26 = vadd.f32 %v2558_v21, %v994_v22  ;;  %v2567_v22 = vld [vmem:[%s3536_s2 + $0x20] sm:$0xff] }
 0x87e   :  { %v995_v28 = vmul.f32 %v2557_v18, %v987_v24  ;;  %2781 = vmatprep.mubr.msk.f32.mxu1 %vm90_vm0, %v3275_v26  ;;  %v2570_v18 = vld [vmem:[%s3536_s2 + $0x38] sm:$0xff] }
 0x87f   :  { %2803 = vmatprep.subr.mxu1 %v2570_v18 }
 0x880   :  { %v1003_v29 = vadd.f32 %v2558_v21, %v995_v28  ;;  %v2568_v21 = vld [vmem:[%s3536_s2 + $0x28] sm:$0xff] }
 0x882   :  { %2782 = vmatmul.mubr.msk.f32.vlgmr.msra.gmra.mxu1 %vm90_vm0, %v1003_v29 }
 0x883   :  { %2804 = vmatpush3.msra.mxu1 %v2570_v18 }
 0x884   :  { %2805 = vmatprep.subr.mxu1 %v2569_v19 }
 0x885   :  { %2806 = vmatpush3.msra.mxu1 %v2569_v19 }
 0x886   :  { %2807 = vmatprep.subr.mxu1 %v2568_v21 }
 0x887   :  { %2808 = vmatpush3.msra.mxu1 %v2568_v21 }
 0x888   :  { %2809 = vmatprep.subr.mxu1 %v2567_v22 }
 0x889   :  { %2810 = vmatpush3.msra.mxu1 %v2567_v22 }
 0x88a   :  { %2814 = vmatprep.subr.mxu1 %v3017_v6 }
 0x942   :  { %v2783_v10 = vpop.f32.mrf.mxu1 }
 0x943   :  { %v1093_v39 = vadd.f32 %v2783_v10, %v2559_v38 }
 0x944   :  { %v1087_v40 = vpop.f32.mrf.mxu1 }
 0x945   :  { %v1099_v41 = vmul.f32 0.044715, %v1093_v39  ;;  %v1088_v42 = vadd.f32 %v2559_v38, %v1087_v40  ;;  %v1097_v57 = vmul.f32 0.5, %v1093_v39  ;;  %v2572_v40 = vld [vmem:[%s3537_s3 + $0x1] ss:$0 sm:$0xff] }
 0x947   :  { %v1101_v43 = vmul.f32 %v1099_v41, %v1093_v39  ;;  %v1098_v44 = vmul.f32 0.044715, %v1088_v42  ;;  %v1096_v55 = vmul.f32 0.5, %v1088_v42 }
 0x949   :  { %v1103_v45 = vmul.f32 %v1101_v43, %v1093_v39  ;;  %v1100_v46 = vmul.f32 %v1098_v44, %v1088_v42 }
 0x94b   :  { %v1105_v47 = vadd.f32 %v1103_v45, %v1093_v39  ;;  %v1102_v48 = vmul.f32 %v1100_v46, %v1088_v42 }
 0x94d   :  { %v1107_v49 = vmul.f32 0.7978846, %v1105_v47  ;;  %v1104_v50 = vadd.f32 %v1102_v48, %v1088_v42 }
 0x94f   :  { %2928 = vtanh.f32 %v1107_v49  ;;  %v1106_v51 = vmul.f32 0.7978846, %v1104_v50 }
 0x951   :  { %2930 = vtanh.f32 %v1106_v51 }
 0x95c   :  { %v2929_v52 = vpop.eup %2928 }
 0x95d   :  { %v1111_v54 = vadd.f32 1.0, %v2929_v52 }
 0x95e   :  { %v2931_v53 = vpop.eup %2930 }
 0x95f   :  { %v1110_v56 = vadd.f32 1.0, %v2931_v53  ;;  %v1113_v59 = vmul.f32 %v1111_v54, %v1097_v57 }
 0x961   :  { %v1112_v58 = vmul.f32 %v1110_v56, %v1096_v55 }
 0x963   :  { %2800 = vmatprep.mubr.msk.f32.mxu0 %vm1129_vm5, %v1112_v58 }
 0x964   :  { %2801 = vmatmul.mubr.msk.f32.vlgmr.msra.gmra.mxu0 %vm1129_vm5, %v1113_v59 }
 0x965   :  { %2826 = vmatprep.mubr.msk.f32.mxu0 %vm3018_vm1, %v3017_v6 }
 0xa24   :  { %v2802_v61 = vpop.f32.mrf.mxu0 }
 0xa25   :  { %v1208_v62 = vadd.f32 %v2802_v61, %v2562_v60 }
 0xa26   :  { %v1202_v63 = vpop.f32.mrf.mxu0 }
 0xa27   :  { %v1203_v0 = vadd.f32 %v2562_v60, %v1202_v63  ;;  %v1212_v1 = vadd.f32 %v1208_v62, %v1003_v29 }
 0xa29   :  { %v1218_v3 = vsel %vm90_vm0, %v1212_v1, 0.0  ;;  %v1211_v5 = vadd.f32 %v1203_v0, %v3275_v26 }
 0xa2a   :  { %1219 = vadd.xlane.f32.xlu0 %v1218_v3 }
 0xa2b   :  { %v1215_v2 = vsel %vm90_vm0, %v1211_v5, 0.0 }
 0xa2c   :  { %1216 = vadd.xlane.f32.xlu1 %v1215_v2 }
 0xab3   :  { %v1220_v4 = vpop.xlane.xlu0 %1219 }
 0xab4   :  { %v1222_v7 = vmul.f32 0.03125, %v1220_v4 }
 0xab5   :  { %v1217_v8 = vpop.xlane.xlu1 %1216 }
 0xab6   :  { %v1224_v9 = vsub.f32 %v1212_v1, %v1222_v7  ;;  %v1221_v12 = vmul.f32 0.03125, %v1217_v8 }
 0xab8   :  { %v1223_v13 = vsub.f32 %v1211_v5, %v1221_v12  ;;  %v1226_v14 = vmul.f32 %v1224_v9, %v1224_v9 }
 0xaba   :  { %v1230_v15 = vsel %vm90_vm0, %v1226_v14, 0.0  ;;  %v1225_v16 = vmul.f32 %v1223_v13, %v1223_v13 }
 0xabb   :  { %1231 = vadd.xlane.f32.xlu0 %v1230_v15 }
 0xabc   :  { %v1227_v17 = vsel %vm90_vm0, %v1225_v16, 0.0 }
 0xabd   :  { %1228 = vadd.xlane.f32.xlu1 %v1227_v17 }
 0xb44   :  { %v1232_v23 = vpop.xlane.xlu0 %1231 }
 0xb45   :  { %v1234_v24 = vmul.f32 0.03125, %v1232_v23 }
 0xb46   :  { %v1229_v26 = vpop.xlane.xlu1 %1228 }
 0xb47   :  { %v1236_v28 = vadd.f32 1e-12, %v1234_v24  ;;  %v1233_v29 = vmul.f32 0.03125, %v1229_v26 }
 0xb49   :  { %2932 = vrsqrt.f32 %v1236_v28  ;;  %v1235_v30 = vadd.f32 1e-12, %v1233_v29 }
 0xb4b   :  { %2934 = vrsqrt.f32 %v1235_v30 }
 0xb56   :  { %v2933_v11 = vpop.eup %2932 }
 0xb57   :  { %v1240_v32 = vmul.f32 %v2933_v11, %v1224_v9 }
 0xb58   :  { %v2935_v34 = vpop.eup %2934 }
 0xb59   :  { %v1239_v35 = vmul.f32 %v2935_v34, %v1223_v13  ;;  %v1248_v36 = vmul.f32 %v2565_v31, %v1240_v32 }
 0xb5b   :  { %v1247_v38 = vmul.f32 %v2565_v31, %v1239_v35  ;;  %v3341_v39 = vadd.f32 %v2566_v37, %v1248_v36 }
 0xb5d   :  { %v3339_v10 = vadd.f32 %v2566_v37, %v1247_v38 }
 0xb5f   :  { %2811 = vmatprep.mubr.msk.f32.mxu1 %vm90_vm0, %v3339_v10 }
 0xb60   :  { %2812 = vmatmul.mubr.msk.f32.vlgmr.msra.gmra.mxu1 %vm90_vm0, %v3341_v39 }
 0xb61   :  { %2816 = vmatprep.mubr.msk.f32.mxu1 %vm3018_vm1, %v3017_v6 }
 0xc20   :  { %v2813_v41 = vpop.f32.mrf.mxu1 }
 0xc21   :  { %v3352_v42 = vadd.f32 %v2813_v41, %v2572_v40 }
 0xc22   :  { %v1342_v43 = vpop.f32.mrf.mxu1 }
 0xc23   :  { %v3354_v44 = vadd.f32 %v2572_v40, %v1342_v43  ;;  %1429 = vrot.lane.b32.xlu0 %v3352_v42, %s3019_s16 }
 0xc25   :  { %1352 = vrot.lane.b32.xlu1 %v3354_v44, %s3019_s16 }
 0xc95   :  { %v1430_v46 = vpop.permute.xlu0 %1429 }
 0xc97   :  { %v1353_v45 = vpop.permute.xlu1 %1352 }
 0xc98   :  { %2815 = vmatpush3.xpose.msk.msra.mxu1 %vm175_vm2, %v1353_v45 }
 0xc99   :  { %2819 = vmatprep.subr.mxu1 %v3017_v6 }
 0xc9b   :  { %2817 = vmatmul.mubr.msk.f32.vlgmr.msra.gmra.mxu1 %vm175_vm2, %v3354_v44 }
 0xc9c   :  { %2820 = vmatpush3.xpose.msk.msra.mxu1 %vm175_vm2, %v1430_v46  ;;  %2821 = vmatprep.mubr.msk.f32.mxu1 %vm3018_vm1, %v3017_v6 }
 0xc9d   :  { %2829 = vmatprep.subr.mxu1 %v3017_v6 }
 0xc9f   :  { %2822 = vmatmul.mubr.msk.f32.vlgmr.msra.gmra.mxu1 %vm175_vm2, %v3352_v42 }
 0xca0   :  { %2831 = vmatprep.mubr.msk.f32.mxu1 %vm3018_vm1, %v3017_v6 }
 0xd5b   :  { %v1424_v47 = vpop.f32.mrf.mxu1 }
 0xd5c   :  { %v1505_v48 = vmul.f32 0.25, %v1424_v47 }
 0xd5d   :  { %v2818_v49 = vpop.f32.mrf.mxu1 }
 0xd5e   :  { %v1507_v50 = vadd.f32 %v1505_v48, %v3175_v27 }
 0xd5f   :  { %v1501_v51 = vpop.f32.mrf.mxu1 }
 0xd60   :  { %v1506_v52 = vmul.f32 0.25, %v1501_v51  ;;  %v1509_v53 = vsel %vm341_vm3, %v1507_v50, -inf }
 0xd61   :  { %1510 = vmax.xlane.f32.xlu1 %v1509_v53  ;;  %v2823_v54 = vpop.f32.mrf.mxu1  ;;  %v2588_v53 = vld [vmem:[%s3538_s4 + $0x28] sm:$0xff] }
 0xd62   :  { %v1508_v55 = vadd.f32 %v1506_v52, %v3179_v33  ;;  %v2590_v52 = vld [vmem:[%s3538_s4 + $0x38] sm:$0xff]  ;;  %v2587_v54 = vld [vmem:[%s3538_s4 + $0x20] sm:$0xff] }
 0xd64   :  { %v1512_v56 = vsel %vm341_vm3, %v1508_v55, -inf }
 0xd65   :  { %1513 = vmax.xlane.f32.xlu0 %v1512_v56 }
 0xd72   :  { %1531 = vrot.lane.b32.xlu1 %v3354_v44, %s3021_s19 }
 0xd76   :  { %1687 = vrot.lane.b32.xlu1 %v3354_v44, %s3022_s20 }
 0xd7a   :  { %1765 = vrot.lane.b32.xlu1 %v3352_v42, %s3022_s20 }
 0xd7b   :  { %1607 = vrot.lane.b32.xlu0 %v3352_v42, %s3021_s19 }
 0xdea   :  { %v1511_v57 = vpop.xlane.xlu1 %1510 }
 0xdeb   :  { %v1515_v58 = vsub.f32 %v1507_v50, %v1511_v57 }
 0xded   :  { %v1517_v59 = vmul.f32 1.442695, %v1515_v58 }
 0xdee   :  { %v1532_v60 = vpop.permute.xlu1 %1531  ;;  %v1514_v61 = vpop.xlane.xlu0 %1513 }
 0xdef   :  { %2936 = vpow2.f32 %v1517_v59  ;;  %v1516_v62 = vsub.f32 %v1508_v55, %v1514_v61  ;;  %2825 = vmatpush3.msra.mxu0 %v1532_v60 }
 0xdf0   :  { %2834 = vmatprep.subr.mxu0 %v3017_v6 }
 0xdf1   :  { %v1519_v63 = vmul.f32 1.442695, %v1516_v62 }
 0xdf2   :  { %v1608_v0 = vpop.permute.xlu0 %1607  ;;  %v1688_v4 = vpop.permute.xlu1 %1687 }
 0xdf3   :  { %2938 = vpow2.f32 %v1519_v63  ;;  %2830 = vmatpush3.msra.mxu1 %v1608_v0  ;;  %v2592_v63 = vld [vmem:[%s3539_s5 + $0x1] ss:$0 sm:$0xff] }
 0xdf4   :  { %2839 = vmatprep.subr.mxu1 %v3017_v6 }
 0xdf6   :  { %v1766_v7 = vpop.permute.xlu1 %1765 }
 0xdfc   :  { %v2937_v1 = vpop.eup %2936 }
 0xdfd   :  { %v1521_v3 = vsel %vm341_vm3, %v2937_v1, 0.0 }
 0xdfe   :  { %1522 = vadd.xlane.f32.xlu1 %v1521_v3 }
 0xe00   :  { %v2939_v5 = vpop.eup %2938 }
 0xe01   :  { %v1524_v2 = vsel %vm341_vm3, %v2939_v5, 0.0 }
 0xe02   :  { %1525 = vadd.xlane.f32.xlu0 %v1524_v2 }
 0xe0f   :  { %1763 = vrot.lane.b32.xlu1 %v3352_v42, %s3023_s21 }
 0xe18   :  { %1685 = vrot.lane.b32.xlu0 %v3354_v44, %s3023_s21 }
 0xe87   :  { %v1523_v8 = vpop.xlane.xlu1 %1522 }
 0xe88   :  { %2940 = vrcp.f32 %v1523_v8 }
 0xe8b   :  { %v1526_v9 = vpop.xlane.xlu0 %1525  ;;  %v1764_v17 = vpop.permute.xlu1 %1763 }
 0xe8c   :  { %2942 = vrcp.f32 %v1526_v9 }
 0xe8f   :  { %v1686_v16 = vpop.permute.xlu0 %1685 }
 0xe95   :  { %v2941_v12 = vpop.eup %2940 }
 0xe96   :  { %v1529_v13 = vmul.f32 %v2941_v12, %v2937_v1 }
 0xe98   :  { %2827 = vmatmul.mubr.msk.f32.vlgmr.msra.gmra.mxu0 %vm341_vm3, %v1529_v13 }
 0xe99   :  { %v2943_v14 = vpop.eup %2942  ;;  %2835 = vmatpush3.xpose.msk.msra.mxu0 %vm175_vm2, %v1688_v4  ;;  %2836 = vmatprep.mubr.msk.f32.mxu0 %vm3018_vm1, %v3017_v6 }
 0xe9a   :  { %v1530_v15 = vmul.f32 %v2943_v14, %v2939_v5  ;;  %2844 = vmatprep.subr.mxu0 %v3017_v6 }
 0xe9c   :  { %2832 = vmatmul.mubr.msk.f32.vlgmr.msra.gmra.mxu1 %vm341_vm3, %v1530_v15  ;;  %2837 = vmatmul.mubr.msk.f32.vlgmr.msra.gmra.mxu0 %vm175_vm2, %v1686_v16 }
 0xe9d   :  { %2840 = vmatpush3.xpose.msk.msra.mxu1 %vm175_vm2, %v1766_v7  ;;  %2841 = vmatprep.mubr.msk.f32.mxu1 %vm3018_vm1, %v3017_v6 }
 0xe9e   :  { %2849 = vmatprep.subr.mxu1 %v3017_v6  ;;  %2846 = vmatprep.mubr.msk.f32.mxu0 %vm3018_vm1, %v3017_v6 }
 0xea0   :  { %2842 = vmatmul.mubr.msk.f32.vlgmr.msra.gmra.mxu1 %vm175_vm2, %v1764_v17 }
 0xea1   :  { %2851 = vmatprep.mubr.msk.f32.mxu1 %vm3018_vm1, %v3017_v6 }
 0xf58   :  { %v1603_v18 = vpop.f32.mrf.mxu0 }
 0xf59   :  { %1683 = vst.msk [vmem:[#allocation2] sm:$0xff] %vm175_vm2, %v1603_v18 }
 0xf5a   :  { %v2828_v19 = vpop.f32.mrf.mxu0 }
 0xf5c   :  { %v1679_v21 = vpop.f32.mrf.mxu1  ;;  %v1759_v22 = vpop.f32.mrf.mxu0 }
 0xf5d   :  { %1684 = vst.msk [vmem:[#allocation2 + $0x8] sm:$0xff] %vm175_vm2, %v1679_v21  ;;  %v1841_v23 = vmul.f32 0.25, %v1759_v22  ;;  %v2601_v21 = vld [vmem:[%s3542_s8 + $0x30] sm:$0xff]  ;;  %v2600_v22 = vld [vmem:[%s3542_s8 + $0x28] sm:$0xff] }
 0xf5e   :  { %v2833_v24 = vpop.f32.mrf.mxu1  ;;  %v2838_v26 = vpop.f32.mrf.mxu0 }
 0xf5f   :  { %v1843_v28 = vadd.f32 %v1841_v23, %v3175_v27  ;;  %v2599_v23 = vld [vmem:[%s3542_s8 + $0x20] sm:$0xff] }
 0xf60   :  { %v1837_v29 = vpop.f32.mrf.mxu1 }
 0xf61   :  { %v1842_v30 = vmul.f32 0.25, %v1837_v29  ;;  %v1845_v11 = vsel %vm341_vm3, %v1843_v28, -inf }
 0xf62   :  { %1846 = vmax.xlane.f32.xlu0 %v1845_v11  ;;  %v2843_v31 = vpop.f32.mrf.mxu1 }
 0xf63   :  { %v1844_v6 = vadd.f32 %v1842_v30, %v3179_v33 }
 0xf65   :  { %v1848_v32 = vsel %vm341_vm3, %v1844_v6, -inf }
 0xf66   :  { %1849 = vmax.xlane.f32.xlu1 %v1848_v32 }
 0xf77   :  { %1867 = vrot.lane.b32.xlu1 %v3354_v44, %s3024_s22 }
 0xfeb   :  { %v1847_v34 = vpop.xlane.xlu0 %1846 }
 0xfec   :  { %v1851_v35 = vsub.f32 %v1843_v28, %v1847_v34  ;;  %v2598_v34 = vld [vmem:[%s3541_s7 + $0x1] ss:$0 sm:$0xff] }
 0xfee   :  { %v1853_v36 = vmul.f32 1.442695, %v1851_v35 }
 0xfef   :  { %v1850_v37 = vpop.xlane.xlu1 %1849 }
 0xff0   :  { %2944 = vpow2.f32 %v1853_v36  ;;  %v1852_v27 = vsub.f32 %v1844_v6, %v1850_v37  ;;  %v2597_v6 = vld [vmem:[%s3540_s6 + $0x1] ss:$0 sm:$0xff] }
 0xff2   :  { %v1855_v38 = vmul.f32 1.442695, %v1852_v27 }
 0xff3   :  { %v1868_v40 = vpop.permute.xlu1 %1867 }
 0xff4   :  { %2946 = vpow2.f32 %v1855_v38  ;;  %2845 = vmatpush3.msra.mxu0 %v1868_v40 }
 0xff5   :  { %2854 = vmatprep.subr.mxu0 %v2590_v52 }
 0xffd   :  { %v2945_v41 = vpop.eup %2944 }
 0xffe   :  { %v1857_v43 = vsel %vm341_vm3, %v2945_v41, 0.0 }
 0xfff   :  { %1858 = vadd.xlane.f32.xlu0 %v1857_v43  ;;  %v2613_v43 = vld [vmem:[%s3544_s10 + $0x70] sm:$0xff] }
0x1001   :  { %v2947_v33 = vpop.eup %2946 }
0x1002   :  { %v1860_v45 = vsel %vm341_vm3, %v2947_v33, 0.0 }
0x1003   :  { %1861 = vadd.xlane.f32.xlu0 %v1860_v45  ;;  %v2611_v45 = vld [vmem:[%s3544_s10 + $0x60] sm:$0xff] }
0x1019   :  { %1943 = vrot.lane.b32.xlu0 %v3352_v42, %s3024_s22  ;;  %v2589_v42 = vld [vmem:[%s3538_s4 + $0x30] sm:$0xff] }
0x1088   :  { %v1859_v44 = vpop.xlane.xlu0 %1858 }
0x1089   :  { %2948 = vrcp.f32 %v1859_v44  ;;  %v2610_v44 = vld [vmem:[%s3544_s10 + $0x58] sm:$0xff] }
0x108c   :  { %v1862_v46 = vpop.xlane.xlu0 %1861 }
0x108d   :  { %2950 = vrcp.f32 %v1862_v46  ;;  %v2609_v46 = vld [vmem:[%s3544_s10 + $0x50] sm:$0xff] }
0x1090   :  { %v1944_v47 = vpop.permute.xlu0 %1943 }
0x1091   :  { %2850 = vmatpush3.msra.mxu1 %v1944_v47  ;;  %v2608_v47 = vld [vmem:[%s3544_s10 + $0x48] sm:$0xff] }
0x1096   :  { %v2949_v48 = vpop.eup %2948 }
0x1097   :  { %v1865_v49 = vmul.f32 %v2949_v48, %v2945_v41  ;;  %v2614_v41 = vld [vmem:[%s3544_s10 + $0x78] sm:$0xff]  ;;  %v2607_v48 = vld [vmem:[%s3544_s10 + $0x40] sm:$0xff] }
0x1099   :  { %2847 = vmatmul.mubr.msk.f32.vlgmr.msra.gmra.mxu0 %vm341_vm3, %v1865_v49  ;;  %v2604_v49 = vld [vmem:[%s3543_s9 + $0x1] ss:$0 sm:$0xff] }
0x109a   :  { %v2951_v50 = vpop.eup %2950  ;;  %2855 = vmatpush3.msra.mxu0 %v2590_v52 }
0x109b   :  { %v1866_v51 = vmul.f32 %v2951_v50, %v2947_v33  ;;  %2856 = vmatprep.subr.mxu0 %v2589_v42  ;;  %v2612_v33 = vld [vmem:[%s3544_s10 + $0x68] sm:$0xff] }
0x109c   :  { %2857 = vmatpush3.msra.mxu0 %v2589_v42 }
0x109d   :  { %2852 = vmatmul.mubr.msk.f32.vlgmr.msra.gmra.mxu1 %vm341_vm3, %v1866_v51  ;;  %2858 = vmatprep.subr.mxu0 %v2588_v53 }
0x109e   :  { %2859 = vmatpush3.msra.mxu0 %v2588_v53 }
0x109f   :  { %2860 = vmatprep.subr.mxu0 %v2587_v54 }
0x10a0   :  { %2861 = vmatpush3.msra.mxu0 %v2587_v54 }
0x10a1   :  { %2876 = vmatprep.subr.mxu0 %v2614_v41 }
0x1159   :  { %v1939_v55 = vpop.f32.mrf.mxu0 }
0x115a   :  { %2021 = vrot.lane.b32.xlu1 %v1939_v55, %s3025_s30 }
0x115b   :  { %v2848_v56 = vpop.f32.mrf.mxu0 }
0x115d   :  { %v2015_v57 = vpop.f32.mrf.mxu1 }
0x115e   :  { %2023 = vrot.lane.b32.xlu1 %v2015_v57, %s3025_s30 }
0x115f   :  { %v2853_v58 = vpop.f32.mrf.mxu1 }
0x11cc   :  { %v2022_v59 = vpop.permute.xlu1 %2021 }
0x11cd   :  { %2027 = vst.msk [vmem:[#allocation2] sm:$0xff] %vm860_vm4, %v2022_v59 }
0x11d0   :  { %v2024_v60 = vpop.permute.xlu1 %2023 }
0x11d1   :  { %2028 = vst.msk [vmem:[#allocation2 + $0x8] sm:$0xff] %vm860_vm4, %v2024_v60 }
0x11d4   :  { %v2029_v61 = vld [vmem:[#allocation2] sm:$0xff] }
0x11d5   :  { %2862 = vmatprep.mubr.msk.f32.mxu0 %vm90_vm0, %v2029_v61 }
0x11d8   :  { %v2030_v62 = vld [vmem:[#allocation2 + $0x8] sm:$0xff] }
0x11d9   :  { %2863 = vmatmul.mubr.msk.f32.vlgmr.msra.gmra.mxu0 %vm90_vm0, %v2030_v62 }
0x11da   :  { %2877 = vmatpush3.msra.mxu0 %v2614_v41 }
0x11db   :  { %2878 = vmatprep.subr.mxu0 %v2613_v43 }
0x11dc   :  { %2879 = vmatpush3.msra.mxu0 %v2613_v43 }
0x11dd   :  { %2880 = vmatprep.subr.mxu0 %v2612_v33 }
0x11de   :  { %2881 = vmatpush3.msra.mxu0 %v2612_v33 }
0x11df   :  { %2882 = vmatprep.subr.mxu0 %v2611_v45 }
0x11e0   :  { %2883 = vmatpush3.msra.mxu0 %v2611_v45  ;;  %v2622_v45 = vld [vmem:[%s3547_s13 + $0x1] ss:$0 sm:$0xff] }
0x11e1   :  { %2884 = vmatprep.subr.mxu0 %v2610_v44 }
0x11e2   :  { %2885 = vmatpush3.msra.mxu0 %v2610_v44 }
0x11e3   :  { %2886 = vmatprep.subr.mxu0 %v2609_v46 }
0x11e4   :  { %2887 = vmatpush3.msra.mxu0 %v2609_v46 }
0x11e5   :  { %2888 = vmatprep.subr.mxu0 %v2608_v47 }
0x11e6   :  { %2889 = vmatpush3.msra.mxu0 %v2608_v47 }
0x11e7   :  { %2890 = vmatprep.subr.mxu0 %v2607_v48 }
0x11e8   :  { %2891 = vmatpush3.msra.mxu0 %v2607_v48 }
0x1299   :  { %v2864_v0 = vpop.f32.mrf.mxu0 }
0x129a   :  { %v2122_v1 = vadd.f32 %v2864_v0, %v2592_v63 }
0x129b   :  { %v2116_v3 = vpop.f32.mrf.mxu0 }
0x129c   :  { %v2117_v5 = vadd.f32 %v2592_v63, %v2116_v3  ;;  %v2126_v2 = vadd.f32 %v2122_v1, %v3341_v39 }
0x129e   :  { %v2134_v4 = vsel %vm90_vm0, %v2126_v2, 0.0  ;;  %v2125_v7 = vadd.f32 %v2117_v5, %v3339_v10  ;;  %v2602_v10 = vld [vmem:[%s3542_s8 + $0x38] sm:$0xff] }
0x129f   :  { %2135 = vadd.xlane.f32.xlu1 %v2134_v4  ;;  %2865 = vmatprep.subr.mxu1 %v2602_v10 }
0x12a0   :  { %v2131_v8 = vsel %vm90_vm0, %v2125_v7, 0.0  ;;  %2866 = vmatpush3.msra.mxu1 %v2602_v10 }
0x12a1   :  { %2132 = vadd.xlane.f32.xlu0 %v2131_v8  ;;  %2867 = vmatprep.subr.mxu1 %v2601_v21  ;;  %v2616_v8 = vld [vmem:[%s3545_s11 + $0x1] ss:$0 sm:$0xff] }
0x12a2   :  { %2868 = vmatpush3.msra.mxu1 %v2601_v21 }
0x12a3   :  { %2869 = vmatprep.subr.mxu1 %v2600_v22 }
0x12a4   :  { %2870 = vmatpush3.msra.mxu1 %v2600_v22 }
0x12a5   :  { %2871 = vmatprep.subr.mxu1 %v2599_v23 }
0x12a6   :  { %2872 = vmatpush3.msra.mxu1 %v2599_v23 }
0x1328   :  { %v2136_v9 = vpop.xlane.xlu1 %2135 }
0x1329   :  { %v2138_v12 = vmul.f32 0.03125, %v2136_v9 }
0x132a   :  { %v2133_v13 = vpop.xlane.xlu0 %2132 }
0x132b   :  { %v2137_v14 = vmul.f32 0.03125, %v2133_v13  ;;  %v2140_v15 = vsub.f32 %v2126_v2, %v2138_v12 }
0x132d   :  { %v2139_v16 = vsub.f32 %v2125_v7, %v2137_v14  ;;  %v2142_v19 = vmul.f32 %v2140_v15, %v2140_v15 }
0x132f   :  { %v2141_v17 = vmul.f32 %v2139_v16, %v2139_v16  ;;  %v2146_v39 = vsel %vm90_vm0, %v2142_v19, 0.0 }
0x1331   :  { %v2143_v18 = vsel %vm90_vm0, %v2141_v17, 0.0 }
0x1332   :  { %2144 = vadd.xlane.f32.xlu0 %v2143_v18 }
0x1336   :  { %2147 = vadd.xlane.f32.xlu0 %v2146_v39 }
0x13bb   :  { %v2145_v24 = vpop.xlane.xlu0 %2144 }
0x13bc   :  { %v2149_v26 = vmul.f32 0.03125, %v2145_v24 }
0x13be   :  { %v2151_v28 = vadd.f32 1e-12, %v2149_v26 }
0x13bf   :  { %v2148_v29 = vpop.xlane.xlu0 %2147 }
0x13c0   :  { %2952 = vrsqrt.f32 %v2151_v28  ;;  %v2150_v30 = vmul.f32 0.03125, %v2148_v29 }
0x13c2   :  { %v2152_v11 = vadd.f32 1e-12, %v2150_v30  ;;  %v2972_v30 = vld [vmem:[%s3535_s1] sm:$0x3] }
0x13c4   :  { %2954 = vrsqrt.f32 %v2152_v11  ;;  %v2464_v11 = vsel %vm2463_vm6, %v2972_v30, 0.0 }
0x13cd   :  { %v2953_v31 = vpop.eup %2952 }
0x13ce   :  { %v2155_v32 = vmul.f32 %v2953_v31, %v2139_v16  ;;  %v2442_v31 = vsub.s32 1, %v3168_v20  ;;  %v2621_v20 = vld [vmem:[%s3546_s12 + $0x1] ss:$0 sm:$0xff]  ;;  %s3026_s12 = smov [#allocation5]  }
0x13cf   :  { %s2524_s13 = sshll.u32 %s3026_s12, 4  ;;  %s2525_s13 = int_to_ptr.vmem [resolvable:$true] %s2524_s13 }
0x13d0   :  { %v2163_v35 = vmul.f32 %v2597_v6, %v2155_v32  ;;  %v2443_v32 = vrot.slane %v2972_v30, %v2442_v31  ;;  %s2973_s16 = scalar_lea.vmem %s2525_s13, 256  ;;  %p2978_p1 = scmp.lt.s32.totalorder %s2525_s13, %s2525_s13 }
0x13d1   :  { %v2955_v36 = vpop.eup %2954  ;;  %p2974_p0 = scmp.ne.s32.totalorder %s2525_s13, %s2973_s16  ;;  %p2979_p2 = scmp.lt.s32.totalorder %s2973_s16, %s2973_s16 }
0x13d2   :  { %v2156_v37 = vmul.f32 %v2955_v36, %v2140_v15  ;;  %v3467_v27 = vadd.f32 %v2598_v34, %v2163_v35 }
0x13d3   :  { %p2980_p3 = por %p2979_p2, %p2978_p1 }
0x13d4   :  { %v2164_v38 = vmul.f32 %v2597_v6, %v2156_v37  ;;  %2873 = vmatprep.mubr.msk.f32.mxu1 %vm90_vm0, %v3467_v27  ;;  %v2436_v6 = vrot.slane %v2972_v30, %v3172_v25 }
0x13d5   :  { %p2981_p4 = pnand %p2980_p3, %p2974_p0 }
0x13d6   :  { %v2172_v40 = vadd.f32 %v2598_v34, %v2164_v38 }
0x13d8   :  { %2874 = vmatmul.mubr.msk.f32.vlgmr.msra.gmra.mxu1 %vm90_vm0, %v2172_v40 }
0x1498   :  { %v2875_v50 = vpop.f32.mrf.mxu1 }
0x1499   :  { %v2264_v51 = vadd.f32 %v2875_v50, %v2604_v49 }
0x149a   :  { %v2258_v52 = vpop.f32.mrf.mxu1 }
0x149b   :  { %v2270_v42 = vmul.f32 0.044715, %v2264_v51  ;;  %v2259_v53 = vadd.f32 %v2604_v49, %v2258_v52  ;;  %v2268_v2 = vmul.f32 0.5, %v2264_v51 }
0x149d   :  { %v2272_v54 = vmul.f32 %v2270_v42, %v2264_v51  ;;  %v2269_v55 = vmul.f32 0.044715, %v2259_v53  ;;  %v2267_v3 = vmul.f32 0.5, %v2259_v53 }
0x149f   :  { %v2274_v56 = vmul.f32 %v2272_v54, %v2264_v51  ;;  %v2271_v57 = vmul.f32 %v2269_v55, %v2259_v53 }
0x14a1   :  { %v2276_v58 = vadd.f32 %v2274_v56, %v2264_v51  ;;  %v2273_v59 = vmul.f32 %v2271_v57, %v2259_v53 }
0x14a3   :  { %v2278_v60 = vmul.f32 0.7978846, %v2276_v58  ;;  %v2275_v61 = vadd.f32 %v2273_v59, %v2259_v53 }
0x14a5   :  { %2956 = vtanh.f32 %v2278_v60  ;;  %v2277_v62 = vmul.f32 0.7978846, %v2275_v61 }
0x14a7   :  { %2958 = vtanh.f32 %v2277_v62 }
0x14b2   :  { %v2957_v63 = vpop.eup %2956 }
0x14b3   :  { %v2282_v1 = vadd.f32 1.0, %v2957_v63 }
0x14b4   :  { %v2959_v0 = vpop.eup %2958 }
0x14b5   :  { %v2281_v5 = vadd.f32 1.0, %v2959_v0  ;;  %v2284_v7 = vmul.f32 %v2282_v1, %v2268_v2 }
0x14b7   :  { %v2283_v4 = vmul.f32 %v2281_v5, %v2267_v3 }
0x14b9   :  { %2892 = vmatprep.mubr.msk.f32.mxu0 %vm1129_vm5, %v2283_v4 }
0x14ba   :  { %2893 = vmatmul.mubr.msk.f32.vlgmr.msra.gmra.mxu0 %vm1129_vm5, %v2284_v7 }
0x157a   :  { %v2894_v9 = vpop.f32.mrf.mxu0 }
0x157b   :  { %v2380_v12 = vadd.f32 %v2894_v9, %v2616_v8 }
0x157c   :  { %v2374_v13 = vpop.f32.mrf.mxu0 }
0x157d   :  { %v2375_v14 = vadd.f32 %v2616_v8, %v2374_v13  ;;  %v2384_v15 = vadd.f32 %v2380_v12, %v2172_v40 }
0x157f   :  { %v2392_v16 = vsel %vm90_vm0, %v2384_v15, 0.0  ;;  %v2383_v17 = vadd.f32 %v2375_v14, %v3467_v27 }
0x1580   :  { %2393 = vadd.xlane.f32.xlu1 %v2392_v16 }
0x1581   :  { %v2389_v18 = vsel %vm90_vm0, %v2383_v17, 0.0 }
0x1582   :  { %2390 = vadd.xlane.f32.xlu0 %v2389_v18 }
0x1609   :  { %v2394_v19 = vpop.xlane.xlu1 %2393 }
0x160a   :  { %v2396_v39 = vmul.f32 0.03125, %v2394_v19 }
0x160b   :  { %v2391_v10 = vpop.xlane.xlu0 %2390 }
0x160c   :  { %v2398_v21 = vsub.f32 %v2384_v15, %v2396_v39  ;;  %v2395_v22 = vmul.f32 0.03125, %v2391_v10 }
0x160e   :  { %v2397_v23 = vsub.f32 %v2383_v17, %v2395_v22  ;;  %v2400_v24 = vmul.f32 %v2398_v21, %v2398_v21 }
0x1610   :  { %v2404_v26 = vsel %vm90_vm0, %v2400_v24, 0.0  ;;  %v2399_v28 = vmul.f32 %v2397_v23, %v2397_v23 }
0x1611   :  { %2405 = vadd.xlane.f32.xlu1 %v2404_v26 }
0x1612   :  { %v2401_v29 = vsel %vm90_vm0, %v2399_v28, 0.0 }
0x1613   :  { %2402 = vadd.xlane.f32.xlu0 %v2401_v29 }
0x1615   :  { %2465 = vadd.xlane.f32.xlu1 %v2464_v11 }
0x1626   :  { %2438 = vbcast.lane.b32.xlu1 %v2436_v6, 256 }
0x1629   :  { %2445 = vbcast.lane.b32.xlu0 %v2443_v32, 256 }
0x169a   :  { %v2406_v34 = vpop.xlane.xlu1 %2405 }
0x169b   :  { %v2408_v35 = vmul.f32 0.03125, %v2406_v34 }
0x169c   :  { %v2403_v36 = vpop.xlane.xlu0 %2402 }
0x169d   :  { %v2410_v37 = vadd.f32 1e-12, %v2408_v35  ;;  %v2407_v27 = vmul.f32 0.03125, %v2403_v36 }
0x169e   :  { %v2466_v40 = vpop.xlane.xlu1 %2465 }
0x169f   :  { %2960 = vrsqrt.f32 %v2410_v37  ;;  %v2409_v38 = vadd.f32 1e-12, %v2407_v27  ;;  %v2467_v41 = vmax.f32 %v2466_v40, 1e-09 }
0x16a0   :  { %v2446_v47 = vpop.permute.xlu0 %2445 }
0x16a1   :  { %2962 = vrsqrt.f32 %v2409_v38 }
0x16a2   :  { %2964 = vrcp.f32 %v2467_v41  ;;  %v2439_v50 = vpop.permute.xlu1 %2438 }
0x16ac   :  { %v2961_v43 = vpop.eup %2960 }
0x16ad   :  { %v2414_v33 = vmul.f32 %v2961_v43, %v2398_v21 }
0x16ae   :  { %v2963_v25 = vpop.eup %2962 }
0x16af   :  { %v2422_v44 = vmul.f32 %v2621_v20, %v2414_v33  ;;  %v2413_v46 = vmul.f32 %v2963_v25, %v2397_v23  ;;  %v2965_v60 = vpop.eup %2964 }
0x16b0   :  { %v2470_v1 = vrot.slane %v2965_v60, 1 }
0x16b1   :  { %v2430_v48 = vadd.f32 %v2622_v45, %v2422_v44  ;;  %v2421_v49 = vmul.f32 %v2621_v20, %v2413_v46 }
0x16b3   :  { %2432 = vst.msk [vmem:[#allocation5 + $0x8] sm:$0xff] %vm90_vm0, %v2430_v48  ;;  %v2448_v51 = vmul.f32 %v2446_v47, %v2430_v48  ;;  %v2429_v52 = vadd.f32 %v2622_v45, %v2421_v49 }
0x16b5   :  { %v2456_v42 = vsel %vm90_vm0, %v2448_v51, 0.0  ;;  %2431 = vst.msk [vmem:[#allocation5] sm:$0xff] %vm90_vm0, %v2429_v52  ;;  %v2447_v53 = vmul.f32 %v2439_v50, %v2429_v52 }
0x16b6   :  { %v2457_v54 = vrot.slane %v2456_v42, 4 }
0x16b7   :  { %v2449_v55 = vsel %vm90_vm0, %v2447_v53, 0.0 }
0x16b8   :  { %v2458_v56 = vadd.f32 %v2457_v54, %v2456_v42  ;;  %v2450_v57 = vrot.slane %v2449_v55, 4 }
0x16ba   :  { %v2459_v58 = vrot.slane %v2458_v56, 2  ;;  %v2451_v59 = vadd.f32 %v2450_v57, %v2449_v55 }
0x16bc   :  { %v2460_v61 = vadd.f32 %v2459_v58, %v2458_v56  ;;  %v2452_v62 = vrot.slane %v2451_v59, 2 }
0x16be   :  { %v2461_v63 = vrot.slane %v2460_v61, 1  ;;  %v2453_v0 = vadd.f32 %v2452_v62, %v2451_v59 }
0x16c0   :  { %v2462_v3 = vadd.f32 %v2461_v63, %v2460_v61  ;;  %v2454_v5 = vrot.slane %v2453_v0, 1 }
0x16c2   :  { %v2455_v2 = vadd.f32 %v2454_v5, %v2453_v0  ;;  %v2474_v4 = vmul.f32 %v2470_v1, %v2462_v3 }
0x16c4   :  { %v2473_v7 = vmul.f32 %v2965_v60, %v2455_v2  ;;  %v2476_v8 = vmul.f32 %v2474_v4, %v2474_v4 }
0x16c6   :  { %v2475_v9 = vmul.f32 %v2473_v7, %v2473_v7  ;;  %v2479_v12 = vrot.slane %v2476_v8, 7 }
0x16c8   :  { %v2481_v13 = vsel %vm2480_vm7, %v2479_v12, %v2475_v9 }
0x16c9   :  { %v2484_v14 = vsel %vm2483_vm8, %v2481_v13, 0.0 }
0x16ca   :  { %2485 = vadd.xlane.f32.xlu1 %v2484_v14 }
0x16cb   :  { %2984 = shalt.err (!%p2981_p4)
}
0x16cc   :  { %s3027_s8 = smov 128   ;;  %s3028_s19 = smov 8  }
0x16cd   :  { %2530 = dma.vmem_to_hbm [thread:$0]  %s2525_s13, 256, %s3549_s15, [#allocation6], %s3027_s8, %s3027_s8, %s3028_s19  }
0x16ce   :  { %s3029_s7 = smov [#allocation3]  }
0x16cf   :  { %s2515_s21 = sshll.u32 %s3029_s7, 4  ;;  %s2516_s21 = int_to_ptr.vmem [resolvable:$true] %s2515_s21 }
0x16d0   :  { %s2993_s15 = scalar_lea.vmem %s2516_s21, 32  ;;  %p2998_p6 = scmp.lt.s32.totalorder %s2516_s21, %s2516_s21 }
0x16d1   :  { %p2994_p5 = scmp.ne.s32.totalorder %s2516_s21, %s2993_s15  ;;  %p2999_p7 = scmp.lt.s32.totalorder %s2993_s15, %s2993_s15 }
0x16d3   :  { %p3000_p8 = por %p2999_p7, %p2998_p6 }
0x16d5   :  { %p3001_p9 = pnand %p3000_p8, %p2994_p5 }
0x1753   :  { %v2486_v15 = vpop.xlane.xlu1 %2485 }
0x1754   :  { %2966 = vrsqrt.f32 %v2486_v15  ;;  %vm2489_vm9 = vcmp.eq.f32.partialorder %v2486_v15, inf  ;;  %v2492_v18 = vand.u32 2147483648, %v2486_v15  ;;  %vm2491_vm10 = vcmp.eq.f32.partialorder %v2486_v15, 0.0 }
0x1761   :  { %v2967_v16 = vpop.eup %2966 }
0x1762   :  { %v2488_v17 = vmul.f32 %v2967_v16, %v2486_v15 }
0x1764   :  { %v2490_v19 = vsel %vm2489_vm9, %v2486_v15, %v2488_v17 }
0x1765   :  { %v2493_v39 = vsel %vm2491_vm10, %v2492_v18, %v2490_v19 }
0x1766   :  { %v2494_v10 = vmax.f32 %v2493_v39, 1e-12 }
0x1768   :  { %v2496_v21 = vrot.slane %v2494_v10, 1  ;;  %2968 = vrcp.f32 %v2494_v10 }
0x176a   :  { %2970 = vrcp.f32 %v2496_v21 }
0x1775   :  { %v2969_v22 = vpop.eup %2968 }
0x1776   :  { %v2500_v26 = vmul.f32 %v2969_v22, %v2473_v7 }
0x1777   :  { %v2971_v23 = vpop.eup %2970 }
0x1778   :  { %v2502_v24 = vmul.f32 %v2971_v23, %v2474_v4 }
0x177a   :  { %v2505_v28 = vrot.slane %v2502_v24, 7 }
0x177c   :  { %v2506_v29 = vsel %vm2480_vm7, %v2505_v28, %v2500_v26 }
0x177d   :  { %2508 = vst.msk [vmem:[#allocation3] sm:$0x3] %vm2483_vm8, %v2506_v29 }
0x177e   :  { %3004 = shalt.err (!%p3001_p9)
}
0x177f   :  { %2518 = dma.vmem_to_hbm [thread:$0]  %s2516_s21, 32, %s3548_s14, [#allocation4]  }
0x1780   :  { %3013 = dma.done.wait [#allocation4], 32  }
0x1781   :  { %3014 = vsyncadd [#allocation4], 4294967264 }
0x1782   :  { %3015 = dma.done.wait [#allocation6], 256  }
0x1783   :  { %3016 = vsyncadd [#allocation6], 4294967040 }
0x1784   :  { %2537 = vsyncpa [#allocation4], 1 }
0x1785   :  { %2538 = vsyncpa [#allocation6], 1 }

</bundles_post_ra>
